<compile_context>
chip_gen: v7x
topology: tpu7x:2x2x1
jax: 0.10.0
libtpu: 0.0.40
codegen_flags: <defaults>
</compile_context>

<pallas_src>
import numpy as np
import jax
import jax.numpy as jnp
from jax.experimental import pallas as pl
from jax.experimental.pallas import tpu as pltpu

EPS = 1e-5
K = 7            # conv kernel size
PAD = 3          # conv padding (same-length conv for stride=1)
HALO = 16        # sublane-aligned halo block (>= PAD, multiple of bf16 packing 16)
LANE = 128


# ------------------------------ small helpers -------------------------------

def _round_up(x, m):
    return (x + m - 1) // m * m


def _vmem_limit_bytes():
    """Generation-aware VMEM limit: headroom under 64 MiB parts (v7x), raised
    toward the 128 MiB physical capacity on v5e/v6e."""
    try:
        phys = getattr(pltpu.get_tpu_info(), "vmem_capacity_bytes", 64 * 1024 * 1024)
    except Exception:
        phys = 64 * 1024 * 1024
    if phys >= (96 << 20):
        return 100 << 20        # v5e / v6e (128 MiB physical)
    return 52 << 20             # v7x-class (64 MiB physical): leave headroom


def _target_tile_l(cp, vmem_limit):
    """Derive the L-tile target from the per-step footprint (double-buffered
    bf16 streams + f32 accumulator + per-tap slices), not a constant."""
    per_row = 32 * cp                      # conservative bytes per row (stage 2)
    budget = int(vmem_limit * 0.45)
    cap = 4096 if vmem_limit >= (96 << 20) else 2048
    t = (budget // per_row) // HALO * HALO
    return int(max(HALO, min(cap, t)))


def _choose_tile_l(length, target, n):
    """Pick the L tile. Non-divisible lengths are handled by host padding +
    in-kernel masking, so we never shrink toward HALO just for divisibility.
    Keep n * n_tiles >= 4 so both v7x TensorCores get work."""
    lp = _round_up(length, HALO)
    tl = max(HALO, min(_round_up(target, HALO), lp))
    tl = (tl // HALO) * HALO
    while tl > HALO and n * (-(-lp // tl)) < 4:
        new = max(HALO, ((tl // 2) // HALO) * HALO)
        if new == tl:
            break
        tl = new
    return tl


# ------------------------------ kernel helpers -------------------------------

def _row_mask(base, tile_l, length):
    """Validity mask for the halo'd row buffer (rows map to global positions)."""
    pos = base - HALO + jax.lax.broadcasted_iota(jnp.int32, (tile_l + 2 * HALO, 1), 0)
    return (pos >= 0) & (pos < length)


def _center_mask(base, tile_l, length):
    """Validity mask for the tile's own rows (masks host L-padding for stats)."""
    pos = base + jax.lax.broadcasted_iota(jnp.int32, (tile_l, 1), 0)
    return pos < length


def _conv_taps(xh_bf16, w_ref, tile_l):
    """k=7 'same' conv as 7 accumulating per-tap MXU matmuls (no materialized
    im2col).  xh_bf16: (tile_l + 2*HALO, Cp) bf16; w_ref: (K, Cp, Coutp) bf16.
    Returns f32 (tile_l, Coutp)."""
    off0 = HALO - PAD
    acc = jnp.dot(xh_bf16[off0: off0 + tile_l, :], w_ref[0],
                  preferred_element_type=jnp.float32)
    for k in range(1, K):
        off = off0 + k
        acc = acc + jnp.dot(xh_bf16[off: off + tile_l, :], w_ref[k],
                            preferred_element_type=jnp.float32)
    return acc


def _bn_scale_shift(stats, row, count, gamma, beta):
    """Combine per-tile partial (sum, sum_sq) rows into per-channel affine."""
    s = jnp.sum(stats[:, :, row, :], axis=(0, 1))
    ss = jnp.sum(stats[:, :, row + 1, :], axis=(0, 1))
    mean = s / count
    var = jnp.maximum(ss / count - mean * mean, 0.0)   # biased variance
    scale = gamma * jax.lax.rsqrt(var + EPS)
    shift = beta - mean * scale
    return scale.reshape(1, -1), shift.reshape(1, -1)


# --------------------------------- kernels -----------------------------------

def _make_stage1_kernel(has_proj, tile_l, length):
    """conv1 (per-tap matmuls) -> bf16 h1 + packed partial BN1 (+ shortcut) stats."""
    def kernel(xp_ref, xc_ref, xn_ref, w1_ref, *rest):
        if has_proj:
            wsc_ref, h1_ref, st_ref = rest
        else:
            h1_ref, st_ref = rest
        base = pl.program_id(1) * tile_l
        xh = jnp.concatenate([xp_ref[...], xc_ref[...], xn_ref[...]], axis=0)
        xh = jnp.where(_row_mask(base, tile_l, length), xh, jnp.zeros_like(xh))
        h1 = _conv_taps(xh, w1_ref, tile_l)                         # f32 acc
        cmask = _center_mask(base, tile_l, length)
        h1 = jnp.where(cmask, h1, 0.0)                              # mask L padding
        h1_ref[...] = h1.astype(h1_ref.dtype)                       # bf16 store
        rows = [jnp.sum(h1, axis=0, keepdims=True),
                jnp.sum(h1 * h1, axis=0, keepdims=True)]
        if has_proj:
            s = jnp.dot(xc_ref[...], wsc_ref[...],
                        preferred_element_type=jnp.float32)          # 1x1 conv
            s = jnp.where(cmask, s, 0.0)
            rows += [jnp.sum(s, axis=0, keepdims=True),
                     jnp.sum(s * s, axis=0, keepdims=True)]
        rows.append(jnp.zeros((8 - len(rows), h1.shape[1]), jnp.float32))
        st_ref[...] = jnp.concatenate(rows, axis=0)
    return kernel


def _make_stage2_kernel(tile_l, length):
    """BN1+ReLU on halo'd bf16 h1 -> conv2 (per-tap matmuls) -> bf16 h2 + BN2 stats."""
    def kernel(hp_ref, hc_ref, hn_ref, sc1_ref, sh1_ref, w2_ref, h2_ref, st_ref):
        base = pl.program_id(1) * tile_l
        hh = jnp.concatenate([hp_ref[...], hc_ref[...], hn_ref[...]], axis=0)
        h = jnp.maximum(hh.astype(jnp.float32) * sc1_ref[...] + sh1_ref[...], 0.0)
        h = jnp.where(_row_mask(base, tile_l, length), h, 0.0)      # conv2 zero pad
        h2 = _conv_taps(h.astype(jnp.bfloat16), w2_ref, tile_l)
        cmask = _center_mask(base, tile_l, length)
        h2 = jnp.where(cmask, h2, 0.0)
        h2_ref[...] = h2.astype(h2_ref.dtype)                       # bf16 store
        st_ref[...] = jnp.concatenate(
            [jnp.sum(h2, axis=0, keepdims=True),
             jnp.sum(h2 * h2, axis=0, keepdims=True),
             jnp.zeros((6, h2.shape[1]), jnp.float32)], axis=0)
    return kernel


def _make_stage3_kernel(has_proj):
    """BN2 + shortcut (1x1 conv w/ folded BN_sc scale, or identity) + add + ReLU."""
    def kernel(*refs):
        if has_proj:
            h2_ref, xc_ref, sc2_ref, sh2_ref, wsc_ref, shsc_ref, out_ref = refs
        else:
            h2_ref, xc_ref, sc2_ref, sh2_ref, out_ref = refs
        h2 = h2_ref[...].astype(jnp.float32) * sc2_ref[...] + sh2_ref[...]   # BN2
        if has_proj:
            s = jnp.dot(xc_ref[...], wsc_ref[...],
                        preferred_element_type=jnp.float32)
            s = s + shsc_ref[...]          # BN_sc scale already folded into wsc
        else:
            s = xc_ref[...].astype(jnp.float32)                      # identity
        out_ref[...] = jnp.maximum(h2 + s, 0.0)
    return kernel


# ------------------------------ public wrapper -------------------------------

def residual_block_forward(x_ncl, params, stride=1, tile_l=None):
    """x_ncl: (N, Cin, L) float32, PyTorch NCL layout. Returns (N, Cout, L) f32."""
    if stride != 1:
        # TODO(synk): stride>1 (strided conv + strided projection shortcut) not implemented.
        raise NotImplementedError("only stride=1 is implemented")
    n, cin, length = x_ncl.shape
    cout = params["w1"].shape[0]
    has_proj = (cin != cout)

    cin_p = _round_up(cin, LANE)
    cout_p = _round_up(cout, LANE)
    # TODO(synk): for channel counts << 128 each tap still pads its contraction
    # to 128 lanes (wasted MXU work); repacking K*cin into one 128/256 block is
    # only worthwhile for narrow production configs.

    vmem_limit = _vmem_limit_bytes()
    if tile_l is None:
        tile_l = _choose_tile_l(length, _target_tile_l(max(cin_p, cout_p), vmem_limit), n)
    assert tile_l % HALO == 0 and tile_l >= HALO
    l_pad = _round_up(length, tile_l)
    n_tiles = l_pad // tile_l
    blocks_per_tile = tile_l // HALO
    last_halo_block = l_pad // HALO - 1

    # Host-side layout: NCL -> NLC, zero-pad L to a tile multiple and channels
    # to 128 lanes, bf16 MXU operands.
    # TODO(synk): when residual blocks are stacked, keep this padded-NLC bf16
    # layout as the inter-block interface and transpose/strip only at the model
    # boundary to avoid two extra full-array passes per block.
    x = jnp.transpose(x_ncl, (0, 2, 1))
    x = jnp.pad(x, ((0, 0), (0, l_pad - length), (0, cin_p - cin))).astype(jnp.bfloat16)

    def conv_w(w, cin_real, cin_pad):   # (Cout, Cin, k) -> (k, cin_pad, cout_p) f32
        w = jnp.transpose(w, (2, 1, 0)).astype(jnp.float32)
        return jnp.pad(w, ((0, 0), (0, cin_pad - cin_real), (0, cout_p - cout)))

    def bn_vec(v):
        return jnp.pad(v.astype(jnp.float32), (0, cout_p - cout))

    w1 = conv_w(params["w1"], cin, cin_p).astype(jnp.bfloat16)          # (K, cin_p, cout_p)
    w2 = conv_w(params["w2"], cout, cout_p).astype(jnp.bfloat16)        # (K, cout_p, cout_p)
    g1, b1 = bn_vec(params["g1"]), bn_vec(params["b1"])
    g2, b2 = bn_vec(params["g2"]), bn_vec(params["b2"])
    if has_proj:
        wsc_f32 = conv_w(params["wsc"], cin, cin_p)[0]                  # (cin_p, cout_p)
        wsc = wsc_f32.astype(jnp.bfloat16)
        gsc, bsc = bn_vec(params["gsc"]), bn_vec(params["bsc"])

    # ------------------------------ BlockSpecs --------------------------------
    def prev_spec(cp):   # 16-row halo block just before the tile (clamped at 0)
        return pl.BlockSpec(
            (None, HALO, cp),
            lambda b, t: (b, jnp.maximum(t * blocks_per_tile - 1, 0), 0))

    def center_spec(cp):
        return pl.BlockSpec((None, tile_l, cp), lambda b, t: (b, t, 0))

    def next_spec(cp):   # 16-row halo block just after the tile (clamped at end)
        return pl.BlockSpec(
            (None, HALO, cp),
            lambda b, t: (b, jnp.minimum((t + 1) * blocks_per_tile, last_halo_block), 0))

    def full_spec(shape):   # small weights / per-channel vectors: VMEM residents
        return pl.BlockSpec(shape, lambda b, t, _n=len(shape): (0,) * _n)

    stats_spec = pl.BlockSpec((None, None, 8, cout_p), lambda b, t: (b, t, 0, 0))
    stats_shape = jax.ShapeDtypeStruct((n, n_tiles, 8, cout_p), jnp.float32)
    act_shape = jax.ShapeDtypeStruct((n, l_pad, cout_p), jnp.bfloat16)   # bf16 intermediates
    out_shape_f = jax.ShapeDtypeStruct((n, l_pad, cout_p), jnp.float32)

    grid = (n, n_tiles)
    cparams = pltpu.CompilerParams(
        dimension_semantics=("parallel", "parallel"),
        vmem_limit_bytes=vmem_limit)
    count = float(n * length)   # BN statistics over the *logical* batch x length

    # --------------- stage 1: conv1 + packed BN1 (+ shortcut) stats -----------
    in_specs = [prev_spec(cin_p), center_spec(cin_p), next_spec(cin_p),
                full_spec((K, cin_p, cout_p))]
    inputs = [x, x, x, w1]
    flops1 = 2 * n * l_pad * (K * cin_p) * cout_p
    if has_proj:
        in_specs.append(full_spec((cin_p, cout_p)))
        inputs.append(wsc)
        flops1 += 2 * n * l_pad * cin_p * cout_p
    h1_raw, st1 = pl.pallas_call(
        _make_stage1_kernel(has_proj, tile_l, length),
        grid=grid, in_specs=in_specs,
        out_specs=(center_spec(cout_p), stats_spec),
        out_shape=(act_shape, stats_shape),
        compiler_params=cparams,
        cost_estimate=pl.CostEstimate(
            flops=int(flops1), transcendentals=0,
            bytes_accessed=int(x.size * 2 + w1.size * 2
                               + n * l_pad * cout_p * 2
                               + n * n_tiles * 8 * cout_p * 4)),
    )(*inputs)

    scale1, shift1 = _bn_scale_shift(st1, 0, count, g1, b1)

    # --------------- stage 2: BN1+ReLU -> conv2 + partial BN2 stats -----------
    h2_raw, st2 = pl.pallas_call(
        _make_stage2_kernel(tile_l, length),
        grid=grid,
        in_specs=[prev_spec(cout_p), center_spec(cout_p), next_spec(cout_p),
                  full_spec((1, cout_p)), full_spec((1, cout_p)),
                  full_spec((K, cout_p, cout_p))],
        out_specs=(center_spec(cout_p), stats_spec),
        out_shape=(act_shape, stats_shape),
        compiler_params=cparams,
        cost_estimate=pl.CostEstimate(
            flops=int(2 * n * l_pad * (K * cout_p) * cout_p), transcendentals=0,
            bytes_accessed=int(n * l_pad * cout_p * 4 + w2.size * 2
                               + n * n_tiles * 8 * cout_p * 4)),
    )(h1_raw, h1_raw, h1_raw, scale1, shift1, w2)

    scale2, shift2 = _bn_scale_shift(st2, 0, count, g2, b2)

    # --------------- stage 3: BN2 + shortcut + add + ReLU ---------------------
    in_specs = [center_spec(cout_p), center_spec(cin_p),
                full_spec((1, cout_p)), full_spec((1, cout_p))]
    inputs = [h2_raw, x, scale2, shift2]
    flops3 = 4 * n * l_pad * cout_p
    if has_proj:
        scale_sc, shift_sc = _bn_scale_shift(st1, 2, count, gsc, bsc)
        wsc_scaled = (wsc_f32 * scale_sc).astype(jnp.bfloat16)   # fold BN_sc scale into 1x1 weight
        in_specs += [full_spec((cin_p, cout_p)), full_spec((1, cout_p))]
        inputs += [wsc_scaled, shift_sc]
        flops3 += 2 * n * l_pad * cin_p * cout_p
    out_nlc = pl.pallas_call(
        _make_stage3_kernel(has_proj),
        grid=grid, in_specs=in_specs,
        out_specs=center_spec(cout_p), out_shape=out_shape_f,
        compiler_params=cparams,
        cost_estimate=pl.CostEstimate(
            flops=int(flops3), transcendentals=0,
            bytes_accessed=int(n * l_pad * (cout_p * 2 + cin_p * 2 + cout_p * 4))),
    )(*inputs)

    # Strip lane/length padding, back to PyTorch NCL layout.
    return jnp.transpose(out_nlc[:, :length, :cout], (0, 2, 1))


# ------------------------------ reference (JAX) ------------------------------

def ref_forward(x_ncl, params):
    def conv(x, w, padding):
        return jax.lax.conv_general_dilated(
            x, w, window_strides=(1,), padding=[(padding, padding)],
            dimension_numbers=("NCH", "OIH", "NCH"))

    def bn(x, g, b):
        mean = jnp.mean(x, axis=(0, 2), keepdims=True)
        var = jnp.mean((x - mean) ** 2, axis=(0, 2), keepdims=True)
        return (x - mean) * jax.lax.rsqrt(var + EPS) * g[None, :, None] + b[None, :, None]

    h = jax.nn.relu(bn(conv(x_ncl, params["w1"], PAD), params["g1"], params["b1"]))
    h = bn(conv(h, params["w2"], PAD), params["g2"], params["b2"])
    if "wsc" in params:
        s = bn(conv(x_ncl, params["wsc"], 0), params["gsc"], params["bsc"])
    else:
        s = x_ncl
    return jax.nn.relu(h + s)


# --------------------------------- params ------------------------------------

def init_params(key, cin, cout):
    ks = jax.random.split(key, 7)
    p = {
        "w1": 0.1 * jax.random.normal(ks[0], (cout, cin, K), jnp.float32),
        "g1": 1.0 + 0.1 * jax.random.normal(ks[1], (cout,), jnp.float32),
        "b1": 0.1 * jax.random.normal(ks[2], (cout,), jnp.float32),
        "w2": 0.1 * jax.random.normal(ks[3], (cout, cout, K), jnp.float32),
        "g2": 1.0 + 0.1 * jax.random.normal(ks[4], (cout,), jnp.float32),
        "b2": 0.1 * jax.random.normal(ks[5], (cout,), jnp.float32),
    }
    if cin != cout:
        k7, k8, k9 = jax.random.split(ks[6], 3)
        p["wsc"] = 0.1 * jax.random.normal(k7, (cout, cin, 1), jnp.float32)
        p["gsc"] = 1.0 + 0.1 * jax.random.normal(k8, (cout,), jnp.float32)
        p["bsc"] = 0.1 * jax.random.normal(k9, (cout,), jnp.float32)
    return p


# ----------------------------------- main -------------------------------------

if __name__ == "__main__":
    # Tolerance note: the kernel feeds bf16 operands to the MXU and (per the
    # perf review) now also stores the inter-stage activations in bf16, while
    # the reference is pure f32; 4e-2 covers that quantization, structural bugs
    # would show up as O(1) errors.
    RTOL = ATOL = 4e-2

    key = jax.random.PRNGKey(0)
    kx, kp1, kp2, kx2, kx3, kp3 = jax.random.split(key, 6)

    # Case 1: projection shortcut (inchannel != outchannel), stride=1.
    N, CIN, COUT, L = 2, 4, 8, 16
    x = jax.random.normal(kx, (N, CIN, L), jnp.float32)
    params = init_params(kp1, CIN, COUT)
    out = jax.block_until_ready(residual_block_forward(x, params, stride=1))
    ref = jax.block_until_ready(ref_forward(x, params))
    np.testing.assert_allclose(np.asarray(out), np.asarray(ref), rtol=RTOL, atol=ATOL)

    # Case 2: identity shortcut (inchannel == outchannel), stride=1.
    x2 = jax.random.normal(kx2, (N, COUT, L), jnp.float32)
    params2 = init_params(kp2, COUT, COUT)
    out2 = jax.block_until_ready(residual_block_forward(x2, params2, stride=1))
    ref2 = jax.block_until_ready(ref_forward(x2, params2))
    np.testing.assert_allclose(np.asarray(out2), np.asarray(ref2), rtol=RTOL, atol=ATOL)

    # Case 3: multi-tile length (tile_l < L) to exercise the inter-tile halos
    # and the cross-tile BatchNorm reduction.
    L3 = 32
    x3 = jax.random.normal(kx3, (N, CIN, L3), jnp.float32)
    params3 = init_params(kp3, CIN, COUT)
    out3 = jax.block_until_ready(residual_block_forward(x3, params3, stride=1, tile_l=16))
    ref3 = jax.block_until_ready(ref_forward(x3, params3))
    np.testing.assert_allclose(np.asarray(out3), np.asarray(ref3), rtol=RTOL, atol=ATOL)

    print("KERNEL_OK")
</pallas_src>

<mosaic_0001>
module attributes {stable_mosaic.version = 11 : i64} {
  func.func @kernel(%arg0: i32, %arg1: i32, %arg2: memref<1x16x128xbf16, #tpu.memory_space<vmem>>, %arg3: memref<1x16x128xbf16, #tpu.memory_space<vmem>>, %arg4: memref<1x16x128xbf16, #tpu.memory_space<vmem>>, %arg5: memref<7x128x128xbf16, #tpu.memory_space<vmem>>, %arg6: memref<128x128xbf16, #tpu.memory_space<vmem>>, %arg7: memref<1x16x128xbf16, #tpu.memory_space<vmem>>, %arg8: memref<1x1x8x128xf32, #tpu.memory_space<vmem>>) attributes {dimension_semantics = [#tpu.dimension_semantics<parallel>, #tpu.dimension_semantics<parallel>], iteration_bounds = array<i64: 2, 1>, scalar_prefetch = 0 : i64, scratch_operands = 0 : i64, tpu.core_type = #tpu.core_type<tc>, window_params = [{transform_indices = @transform_0, window_bounds = array<i64: 1, 16, 128>}, {transform_indices = @transform_1, window_bounds = array<i64: 1, 16, 128>}, {transform_indices = @transform_2, window_bounds = array<i64: 1, 16, 128>}, {pipeline_mode = #tpu.pipeline_mode<synchronous>, transform_indices = @transform_3, window_bounds = array<i64: 7, 128, 128>}, {pipeline_mode = #tpu.pipeline_mode<synchronous>, transform_indices = @transform_4, window_bounds = array<i64: 128, 128>}, {transform_indices = @transform_5, window_bounds = array<i64: 1, 16, 128>}, {transform_indices = @transform_6, window_bounds = array<i64: 1, 1, 8, 128>}]} {
    %c16_i32 = arith.constant 16 : i32
    %0 = arith.muli %arg1, %c16_i32 : i32
    %c0 = arith.constant 0 : index
    %c0_0 = arith.constant 0 : index
    %c0_1 = arith.constant 0 : index
    %1 = vector.load %arg2[%c0, %c0_0, %c0_1] : memref<1x16x128xbf16, #tpu.memory_space<vmem>>, vector<1x16x128xbf16>
    %2 = vector.shape_cast %1 : vector<1x16x128xbf16> to vector<16x128xbf16>
    %c0_2 = arith.constant 0 : index
    %c0_3 = arith.constant 0 : index
    %c0_4 = arith.constant 0 : index
    %3 = vector.load %arg3[%c0_2, %c0_3, %c0_4] : memref<1x16x128xbf16, #tpu.memory_space<vmem>>, vector<1x16x128xbf16>
    %4 = vector.shape_cast %3 : vector<1x16x128xbf16> to vector<16x128xbf16>
    %c0_5 = arith.constant 0 : index
    %c0_6 = arith.constant 0 : index
    %c0_7 = arith.constant 0 : index
    %5 = vector.load %arg4[%c0_5, %c0_6, %c0_7] : memref<1x16x128xbf16, #tpu.memory_space<vmem>>, vector<1x16x128xbf16>
    %6 = vector.shape_cast %5 : vector<1x16x128xbf16> to vector<16x128xbf16>
    %7 = tpu.concatenate %2, %4, %6 in 0 : vector<16x128xbf16>, vector<16x128xbf16>, vector<16x128xbf16> -> vector<48x128xbf16>
    %c16_i32_8 = arith.constant 16 : i32
    %8 = arith.subi %0, %c16_i32_8 : i32
    %9 = tpu.iota {dimensions = array<i32: 0>} : vector<48x1xi32>
    %10 = vector.broadcast %8 : i32 to vector<48x1xi32>
    %11 = arith.addi %10, %9 : vector<48x1xi32>
    %c0_i32 = arith.constant 0 : i32
    %12 = vector.broadcast %c0_i32 : i32 to vector<48x1xi32>
    %13 = arith.cmpi sge, %11, %12 : vector<48x1xi32>
    %c16_i32_9 = arith.constant 16 : i32
    %14 = vector.broadcast %c16_i32_9 : i32 to vector<48x1xi32>
    %15 = arith.cmpi slt, %11, %14 : vector<48x1xi32>
    %16 = arith.andi %13, %15 : vector<48x1xi1>
    %cst = arith.constant 0.000000e+00 : bf16
    %17 = vector.broadcast %cst : bf16 to vector<48x128xbf16>
    %18 = vector.shape_cast %16 : vector<48x1xi1> to vector<48x1xi1>
    %19 = vector.broadcast %18 : vector<48x1xi1> to vector<48x128xi1>
    %20 = arith.select %19, %7, %17 : vector<48x128xi1>, vector<48x128xbf16>
    %21 = vector.extract_strided_slice %20 {offsets = [13, 0], sizes = [16, 128], strides = [1, 1]} : vector<48x128xbf16> to vector<16x128xbf16>
    %c0_10 = arith.constant 0 : index
    %c0_11 = arith.constant 0 : index
    %c0_12 = arith.constant 0 : index
    %22 = vector.load %arg5[%c0_10, %c0_11, %c0_12] : memref<7x128x128xbf16, #tpu.memory_space<vmem>>, vector<1x128x128xbf16>
    %23 = vector.shape_cast %22 : vector<1x128x128xbf16> to vector<128x128xbf16>
    %cst_13 = arith.constant dense<0.000000e+00> : vector<16x128xf32>
    %24 = tpu.matmul %21, %23, %cst_13 {dimension_numbers = #tpu.dot_dimension_numbers<[1], [0], [0], [1], [0, 0, 1, 1], [], []>} : vector<16x128xbf16>, vector<128x128xbf16>, vector<16x128xf32> -> vector<16x128xf32>
    %25 = vector.extract_strided_slice %20 {offsets = [14, 0], sizes = [16, 128], strides = [1, 1]} : vector<48x128xbf16> to vector<16x128xbf16>
    %c1 = arith.constant 1 : index
    %c0_14 = arith.constant 0 : index
    %c0_15 = arith.constant 0 : index
    %26 = vector.load %arg5[%c1, %c0_14, %c0_15] : memref<7x128x128xbf16, #tpu.memory_space<vmem>>, vector<1x128x128xbf16>
    %27 = vector.shape_cast %26 : vector<1x128x128xbf16> to vector<128x128xbf16>
    %cst_16 = arith.constant dense<0.000000e+00> : vector<16x128xf32>
    %28 = tpu.matmul %25, %27, %cst_16 {dimension_numbers = #tpu.dot_dimension_numbers<[1], [0], [0], [1], [0, 0, 1, 1], [], []>} : vector<16x128xbf16>, vector<128x128xbf16>, vector<16x128xf32> -> vector<16x128xf32>
    %29 = arith.addf %24, %28 : vector<16x128xf32>
    %30 = vector.extract_strided_slice %20 {offsets = [15, 0], sizes = [16, 128], strides = [1, 1]} : vector<48x128xbf16> to vector<16x128xbf16>
    %c2 = arith.constant 2 : index
    %c0_17 = arith.constant 0 : index
    %c0_18 = arith.constant 0 : index
    %31 = vector.load %arg5[%c2, %c0_17, %c0_18] : memref<7x128x128xbf16, #tpu.memory_space<vmem>>, vector<1x128x128xbf16>
    %32 = vector.shape_cast %31 : vector<1x128x128xbf16> to vector<128x128xbf16>
    %cst_19 = arith.constant dense<0.000000e+00> : vector<16x128xf32>
    %33 = tpu.matmul %30, %32, %cst_19 {dimension_numbers = #tpu.dot_dimension_numbers<[1], [0], [0], [1], [0, 0, 1, 1], [], []>} : vector<16x128xbf16>, vector<128x128xbf16>, vector<16x128xf32> -> vector<16x128xf32>
    %34 = arith.addf %29, %33 : vector<16x128xf32>
    %35 = vector.extract_strided_slice %20 {offsets = [16, 0], sizes = [16, 128], strides = [1, 1]} : vector<48x128xbf16> to vector<16x128xbf16>
    %c3 = arith.constant 3 : index
    %c0_20 = arith.constant 0 : index
    %c0_21 = arith.constant 0 : index
    %36 = vector.load %arg5[%c3, %c0_20, %c0_21] : memref<7x128x128xbf16, #tpu.memory_space<vmem>>, vector<1x128x128xbf16>
    %37 = vector.shape_cast %36 : vector<1x128x128xbf16> to vector<128x128xbf16>
    %cst_22 = arith.constant dense<0.000000e+00> : vector<16x128xf32>
    %38 = tpu.matmul %35, %37, %cst_22 {dimension_numbers = #tpu.dot_dimension_numbers<[1], [0], [0], [1], [0, 0, 1, 1], [], []>} : vector<16x128xbf16>, vector<128x128xbf16>, vector<16x128xf32> -> vector<16x128xf32>
    %39 = arith.addf %34, %38 : vector<16x128xf32>
    %40 = vector.extract_strided_slice %20 {offsets = [17, 0], sizes = [16, 128], strides = [1, 1]} : vector<48x128xbf16> to vector<16x128xbf16>
    %c4 = arith.constant 4 : index
    %c0_23 = arith.constant 0 : index
    %c0_24 = arith.constant 0 : index
    %41 = vector.load %arg5[%c4, %c0_23, %c0_24] : memref<7x128x128xbf16, #tpu.memory_space<vmem>>, vector<1x128x128xbf16>
    %42 = vector.shape_cast %41 : vector<1x128x128xbf16> to vector<128x128xbf16>
    %cst_25 = arith.constant dense<0.000000e+00> : vector<16x128xf32>
    %43 = tpu.matmul %40, %42, %cst_25 {dimension_numbers = #tpu.dot_dimension_numbers<[1], [0], [0], [1], [0, 0, 1, 1], [], []>} : vector<16x128xbf16>, vector<128x128xbf16>, vector<16x128xf32> -> vector<16x128xf32>
    %44 = arith.addf %39, %43 : vector<16x128xf32>
    %45 = vector.extract_strided_slice %20 {offsets = [18, 0], sizes = [16, 128], strides = [1, 1]} : vector<48x128xbf16> to vector<16x128xbf16>
    %c5 = arith.constant 5 : index
    %c0_26 = arith.constant 0 : index
    %c0_27 = arith.constant 0 : index
    %46 = vector.load %arg5[%c5, %c0_26, %c0_27] : memref<7x128x128xbf16, #tpu.memory_space<vmem>>, vector<1x128x128xbf16>
    %47 = vector.shape_cast %46 : vector<1x128x128xbf16> to vector<128x128xbf16>
    %cst_28 = arith.constant dense<0.000000e+00> : vector<16x128xf32>
    %48 = tpu.matmul %45, %47, %cst_28 {dimension_numbers = #tpu.dot_dimension_numbers<[1], [0], [0], [1], [0, 0, 1, 1], [], []>} : vector<16x128xbf16>, vector<128x128xbf16>, vector<16x128xf32> -> vector<16x128xf32>
    %49 = arith.addf %44, %48 : vector<16x128xf32>
    %50 = vector.extract_strided_slice %20 {offsets = [19, 0], sizes = [16, 128], strides = [1, 1]} : vector<48x128xbf16> to vector<16x128xbf16>
    %c6 = arith.constant 6 : index
    %c0_29 = arith.constant 0 : index
    %c0_30 = arith.constant 0 : index
    %51 = vector.load %arg5[%c6, %c0_29, %c0_30] : memref<7x128x128xbf16, #tpu.memory_space<vmem>>, vector<1x128x128xbf16>
    %52 = vector.shape_cast %51 : vector<1x128x128xbf16> to vector<128x128xbf16>
    %cst_31 = arith.constant dense<0.000000e+00> : vector<16x128xf32>
    %53 = tpu.matmul %50, %52, %cst_31 {dimension_numbers = #tpu.dot_dimension_numbers<[1], [0], [0], [1], [0, 0, 1, 1], [], []>} : vector<16x128xbf16>, vector<128x128xbf16>, vector<16x128xf32> -> vector<16x128xf32>
    %54 = arith.addf %49, %53 : vector<16x128xf32>
    %55 = tpu.iota {dimensions = array<i32: 0>} : vector<16x1xi32>
    %56 = vector.broadcast %0 : i32 to vector<16x1xi32>
    %57 = arith.addi %56, %55 : vector<16x1xi32>
    %c16_i32_32 = arith.constant 16 : i32
    %58 = vector.broadcast %c16_i32_32 : i32 to vector<16x1xi32>
    %59 = arith.cmpi slt, %57, %58 : vector<16x1xi32>
    %cst_33 = arith.constant 0.000000e+00 : f32
    %60 = vector.shape_cast %59 : vector<16x1xi1> to vector<16x1xi1>
    %61 = vector.broadcast %60 : vector<16x1xi1> to vector<16x128xi1>
    %62 = vector.broadcast %cst_33 : f32 to vector<16x128xf32>
    %63 = arith.select %61, %54, %62 : vector<16x128xi1>, vector<16x128xf32>
    %64 = arith.truncf %63 : vector<16x128xf32> to vector<16x128xbf16>
    %c0_34 = arith.constant 0 : index
    %c0_35 = arith.constant 0 : index
    %c0_36 = arith.constant 0 : index
    %65 = vector.load %arg7[%c0_34, %c0_35, %c0_36] : memref<1x16x128xbf16, #tpu.memory_space<vmem>>, vector<1x16x128xbf16>
    %66 = vector.shape_cast %65 : vector<1x16x128xbf16> to vector<16x128xbf16>
    %67 = vector.shape_cast %64 : vector<16x128xbf16> to vector<1x16x128xbf16>
    tpu.vector_store %arg7[%c0_34, %c0_35, %c0_36], %67 {strides = array<i32>} : memref<1x16x128xbf16, #tpu.memory_space<vmem>>, vector<1x16x128xbf16>,
    %cst_37 = arith.constant dense<0.000000e+00> : vector<128xf32>
    %68 = vector.multi_reduction <add>, %63, %cst_37 [0] : vector<16x128xf32> to vector<128xf32>
    %69 = vector.shape_cast %68 : vector<128xf32> to vector<1x128xf32>
    %70 = arith.mulf %63, %63 : vector<16x128xf32>
    %cst_38 = arith.constant dense<0.000000e+00> : vector<128xf32>
    %71 = vector.multi_reduction <add>, %70, %cst_38 [0] : vector<16x128xf32> to vector<128xf32>
    %72 = vector.shape_cast %71 : vector<128xf32> to vector<1x128xf32>
    %c0_39 = arith.constant 0 : index
    %c0_40 = arith.constant 0 : index
    %c0_41 = arith.constant 0 : index
    %73 = vector.load %arg3[%c0_39, %c0_40, %c0_41] : memref<1x16x128xbf16, #tpu.memory_space<vmem>>, vector<1x16x128xbf16>
    %74 = vector.shape_cast %73 : vector<1x16x128xbf16> to vector<16x128xbf16>
    %c0_42 = arith.constant 0 : index
    %c0_43 = arith.constant 0 : index
    %75 = vector.load %arg6[%c0_42, %c0_43] : memref<128x128xbf16, #tpu.memory_space<vmem>>, vector<128x128xbf16>
    %cst_44 = arith.constant dense<0.000000e+00> : vector<16x128xf32>
    %76 = tpu.matmul %74, %75, %cst_44 {dimension_numbers = #tpu.dot_dimension_numbers<[1], [0], [0], [1], [0, 0, 1, 1], [], []>} : vector<16x128xbf16>, vector<128x128xbf16>, vector<16x128xf32> -> vector<16x128xf32>
    %cst_45 = arith.constant 0.000000e+00 : f32
    %77 = vector.shape_cast %59 : vector<16x1xi1> to vector<16x1xi1>
    %78 = vector.broadcast %77 : vector<16x1xi1> to vector<16x128xi1>
    %79 = vector.broadcast %cst_45 : f32 to vector<16x128xf32>
    %80 = arith.select %78, %76, %79 : vector<16x128xi1>, vector<16x128xf32>
    %cst_46 = arith.constant dense<0.000000e+00> : vector<128xf32>
    %81 = vector.multi_reduction <add>, %80, %cst_46 [0] : vector<16x128xf32> to vector<128xf32>
    %82 = vector.shape_cast %81 : vector<128xf32> to vector<1x128xf32>
    %83 = arith.mulf %80, %80 : vector<16x128xf32>
    %cst_47 = arith.constant dense<0.000000e+00> : vector<128xf32>
    %84 = vector.multi_reduction <add>, %83, %cst_47 [0] : vector<16x128xf32> to vector<128xf32>
    %85 = vector.shape_cast %84 : vector<128xf32> to vector<1x128xf32>
    %cst_48 = arith.constant 0.000000e+00 : f32
    %86 = vector.broadcast %cst_48 : f32 to vector<4x128xf32>
    %87 = tpu.concatenate %69, %72, %82, %85, %86 in 0 : vector<1x128xf32>, vector<1x128xf32>, vector<1x128xf32>, vector<1x128xf32>, vector<4x128xf32> -> vector<8x128xf32>
    %c0_49 = arith.constant 0 : index
    %c0_50 = arith.constant 0 : index
    %c0_51 = arith.constant 0 : index
    %c0_52 = arith.constant 0 : index
    %88 = vector.load %arg8[%c0_49, %c0_50, %c0_51, %c0_52] : memref<1x1x8x128xf32, #tpu.memory_space<vmem>>, vector<1x1x8x128xf32>
    %89 = vector.shape_cast %88 : vector<1x1x8x128xf32> to vector<8x128xf32>
    %90 = vector.shape_cast %87 : vector<8x128xf32> to vector<1x1x8x128xf32>
    tpu.vector_store %arg8[%c0_49, %c0_50, %c0_51, %c0_52], %90 {strides = array<i32>} : memref<1x1x8x128xf32, #tpu.memory_space<vmem>>, vector<1x1x8x128xf32>,
    return
  }
  func.func @transform_0(%arg0: i32, %arg1: i32) -> (i32, i32, i32) {
    %c1_i32 = arith.constant 1 : i32
    %0 = arith.muli %arg1, %c1_i32 : i32
    %c1_i32_0 = arith.constant 1 : i32
    %1 = arith.subi %0, %c1_i32_0 : i32
    %c0_i32 = arith.constant 0 : i32
    %2 = arith.maxsi %1, %c0_i32 : i32
    %c0_i32_1 = arith.constant 0 : i32
    %c0_i32_2 = arith.constant 0 : i32
    return %arg0, %2, %c0_i32_1 : i32, i32, i32
  }
  func.func @transform_1(%arg0: i32, %arg1: i32) -> (i32, i32, i32) {
    %c0_i32 = arith.constant 0 : i32
    %c0_i32_0 = arith.constant 0 : i32
    return %arg0, %arg1, %c0_i32 : i32, i32, i32
  }
  func.func @transform_2(%arg0: i32, %arg1: i32) -> (i32, i32, i32) {
    %c1_i32 = arith.constant 1 : i32
    %0 = arith.addi %arg1, %c1_i32 : i32
    %c1_i32_0 = arith.constant 1 : i32
    %1 = arith.muli %0, %c1_i32_0 : i32
    %c0_i32 = arith.constant 0 : i32
    %2 = arith.minsi %1, %c0_i32 : i32
    %c0_i32_1 = arith.constant 0 : i32
    %c0_i32_2 = arith.constant 0 : i32
    return %arg0, %2, %c0_i32_1 : i32, i32, i32
  }
  func.func @transform_3(%arg0: i32, %arg1: i32) -> (i32, i32, i32) {
    %c0_i32 = arith.constant 0 : i32
    %c0_i32_0 = arith.constant 0 : i32
    %c0_i32_1 = arith.constant 0 : i32
    %c0_i32_2 = arith.constant 0 : i32
    return %c0_i32, %c0_i32_0, %c0_i32_1 : i32, i32, i32
  }
  func.func @transform_4(%arg0: i32, %arg1: i32) -> (i32, i32) {
    %c0_i32 = arith.constant 0 : i32
    %c0_i32_0 = arith.constant 0 : i32
    %c0_i32_1 = arith.constant 0 : i32
    return %c0_i32, %c0_i32_0 : i32, i32
  }
  func.func @transform_5(%arg0: i32, %arg1: i32) -> (i32, i32, i32) {
    %c0_i32 = arith.constant 0 : i32
    %c0_i32_0 = arith.constant 0 : i32
    return %arg0, %arg1, %c0_i32 : i32, i32, i32
  }
  func.func @transform_6(%arg0: i32, %arg1: i32) -> (i32, i32, i32, i32) {
    %c0_i32 = arith.constant 0 : i32
    %c0_i32_0 = arith.constant 0 : i32
    %c0_i32_1 = arith.constant 0 : i32
    return %arg0, %arg1, %c0_i32, %c0_i32_0 : i32, i32, i32, i32
  }
}

</mosaic_0001>

<bundles_post_ra>
// kernel: tpu_custom_call.1
= control target key start
LH: loop header
LB: loop body
LE: loop exit
PB: predicated region body
PF: predicated region fallthrough
CT: control target
= control target key end

     0   :  { %s3156_s0 = inlined_call_operand.hbm [shape: bf16[2,16,128], index: 0, kind: input, shape index: {}]   ;;  %s3157_s1 = inlined_call_operand.hbm [shape: bf16[2,16,128], index: 1, kind: input, shape index: {}]   ;;  %s3158_s2 = inlined_call_operand.hbm [shape: bf16[2,16,128], index: 2, kind: input, shape index: {}]   ;;  %s3159_s3 = inlined_call_operand.hbm [shape: bf16[7,128,128], index: 3, kind: input, shape index: {}]   ;;  %s3160_s4 = inlined_call_operand.hbm [shape: bf16[128,128], index: 4, kind: input, shape index: {}]   ;;  %s3161_s5 = inlined_call_operand.hbm [shape: bf16[2,16,128], index: 5, kind: output, shape index: {0}]   ;;  %s3162_s6 = inlined_call_operand.hbm [shape: f32[2,1,8,128], index: 6, kind: output, shape index: {1}]  }
   0x1   :  { %3185 = sst [smem:[#allocation25_spill]] %s3157_s1 }
   0x2   :  { %3186 = sst [smem:[#allocation26_spill]] %s3159_s3 }
   0x3   :  { %3187 = sst [smem:[#allocation27_spill]] %s3160_s4 }
   0x4   :  { %12 = vsyncpa [#allocation3], 0 }
   0x5   :  { %14 = vsyncpa [#allocation3 + $0x1], 0 }
   0x6   :  { %15 = vsyncpa [#allocation6], 0 }
   0x7   :  { %17 = vsyncpa [#allocation6 + $0x1], 0 }
   0x8   :  { %18 = vsyncpa [#allocation9], 0 }
   0x9   :  { %19 = vsyncpa [#allocation4], 0 }
   0xa   :  { %21 = vsyncpa [#allocation4 + $0x1], 0 }
   0xb   :  { %22 = vsyncpa [#allocation13], 0 }
   0xc   :  { %24 = vsyncpa [#allocation13 + $0x1], 0  ;;  %s2615_s21 = smov 0   ;;  %s2617_s22 = smov 0  }
   0xd   :  { %s2619_s23 = smov 0   ;;  %s2621_s24 = smov 0  }
   0xe   :  { %s2623_s25 = smov 0   ;;  %s2625_s26 = smov 0  }
   0xf LB: > { %3188 = sst [smem:[#allocation19_spill]] %s2543_s21  ;;  %s2646_s27 = sadd.s32 4294967295, %s2563_s26   ;;  %s2563_s26 = sphi %s2625_s26, %s30_s26   ;;  %s2559_s25 = sphi %s2623_s25, %s3231_s25   ;;  %s2555_s24 = sphi %s2621_s24, %s3230_s24   ;;  %s2551_s23 = sphi %s2619_s23, %s3234_s23   ;;  %s2547_s22 = sphi %s2617_s22, %s3233_s22   ;;  %s2543_s21 = sphi %s2615_s21, %s3232_s21  }
  0x10   : > { %3189 = sst [smem:[#allocation20_spill]] %s2559_s25  ;;  %s1753_s28 = sadd.s32 4294967294, %s2563_s26  }
  0x11   : > { %3190 = sst [smem:[#allocation21_spill]] %s2563_s26  ;;  %p64_p0 = scmp.ne.s32.totalorder %s2551_s23, %s2547_s22 }
  0x12   : > { %p65_p1 = scmp.eq.s32.totalorder %s2563_s26, 0  ;;  %p70_p2 = scmp.ne.s32.totalorder %s2547_s22, %s2543_s21 }
  0x13   : > { %p3163_p3 = scmp.eq.s32.totalorder %s2646_s27, 0  ;;  %p200_p5 = scmp.eq.s32.totalorder %s2646_s27, 1 }
  0x14   : > { %p2655_p4 = por %p65_p1, %p64_p0  ;;  %p206_p7 = scmp.eq.s32.totalorder %s1753_s28, 1 }
  0x15   : > { %p2662_p6 = por %p3163_p3, %p70_p2  ;;  %p2666_p8 = por %p200_p5, %p64_p0 }
  0x16   : > { %p1754_p9 = scmp.ge.s32.totalorder %s2563_s26, 1  ;;  %p2671_p10 = por %p206_p7, %p70_p2 }
  0x17   : > { %s3192_s30 = scalar_select %p2662_p6, 1, 0 }
  0x18   : > { %s3193_s7 = scalar_select %p2666_p8, 1, 0 }
  0x19   : > { %s3194_s8 = scalar_select %p2671_p10, 1, 0 }
  0x1a   : > { %p241_p11 = scmp.lt.s32.totalorder %s2563_s26, 3  ;;  %s2565_s10 = smov [#allocation8]  }
  0x1b   : > { %3195 = sst [smem:[#allocation22_spill]] %s3194_s8  ;;  %s253_s11 = sshll.u32 %s2565_s10, 4  ;;  %s2680_s11 = int_to_ptr.vmem [resolvable:$true] %s253_s11 }
  0x1c   : > { %p2676_p12 = pnand %p1754_p9, %p241_p11  ;;  %s42_s13 = sadd.s32 1, %s2559_s25 }
  0x1d   : > { %p2693_p2 = scmp.ge.s32.totalorder %s42_s13, 2  ;;  %s3199_s3 = sld [smem:[#allocation26_spill]] }
  0x1e   : > { %s3196_s9 = scalar_select %p2676_p12, 1, 0 }
  0x1f   : > { %p2139_p13 = pneg %p2676_p12 }
  0x21   : > { %p2687_p1 = pnand %p2139_p13, %p3163_p3 }
  0x23   : > { %s3197_s12 = scalar_select %p2687_p1, 1, 0 }
  0x24   : > { %s2295_s18 = scalar_lea.hbm %s3199_s3, 7168  ;;  %p3175_p7 = pneg %p2687_p1 }
  0x25   : > { %p2296_p5 = scmp.ne.s32.totalorder %s3199_s3, %s2295_s18  ;;  %p2302_p13 = scmp.lt.u32.totalorder %s2295_s18, %s3199_s3 }
  0x27   : > { %p2298_p9 = pnand %p3175_p7, %p2296_p5 }
  0x29   : > { %p2299_p11 = pneg %p2298_p9 }
  0x2b   : > { %p2304_p0 = pnand %p2302_p13, %p2299_p11 }
  0x2d   : > { %2307 = shalt.err (!%p2304_p0)
}
  0x2e   : > { %s2308_s16 = scalar_lea.vmem %s2680_s11, 7168  ;;  %p2316_p6 = scmp.lt.s32.totalorder %s2680_s11, %s2680_s11 }
  0x2f   : > { %p2309_p3 = scmp.ne.s32.totalorder %s2680_s11, %s2308_s16  ;;  %p2317_p5 = scmp.lt.s32.totalorder %s2308_s16, %s2308_s16 }
  0x31   : > { %p2311_p10 = pnand %p2309_p3, %p3175_p7  ;;  %p2318_p9 = por %p2317_p5, %p2316_p6 }
  0x33   : > { %p2312_p8 = pneg %p2311_p10 }
  0x35   : > { %p2319_p12 = pnand %p2318_p9, %p2312_p8 }
  0x37   : > { %2322 = shalt.err (!%p2319_p12)
}
  0x38   : > { %s3168_s17 = smov 64   ;;  %s3171_s18 = smov 4  }
  0x39   : > { %2142 = dma.hbm_to_vmem [thread:$0]  (!%p2687_p1), %s3199_s3, 7168, %s2680_s11, [#allocation9], %s3168_s17, %s3168_s17, %s3171_s18  }
  0x3a   : > { %s3236_s13 = smov (%p2693_p2, %s42_s13), 0  ;;  %p2165_p3 = scmp.lt.s32.totalorder %s2563_s26, 2 }
  0x3b   : > { %3200 = sst [smem:[#allocation23_spill]] %s3236_s13  ;;  %s3170_s28 = sand.u32 1, %s2551_s23  }
  0x3c   : > { %s52_s10 = ssub.s32 %s2559_s25, %s3236_s13  ;;  %s2737_s16 = sshll.u32 %s3170_s28, 3 }
  0x3d   : > { %p55_p6 = scmp.eq.s32.totalorder %s52_s10, 0  ;;  %s2740_s14 = sshll.u32 %s2559_s25, 7 }
  0x3e   : > { %p2744_p8 = pnand %p2165_p3, %p2655_p4  ;;  %s306_s11 = sand.u32 1, %s2563_s26  }
  0x3f   : > { %s3202_s15 = sadd.s32 1, %s2551_s23  ;;  %s3204_s1 = sld [smem:[#allocation25_spill]] }
  0x40   : > { %s3201_s8 = scalar_select %p2744_p8, 1, 0 }
  0x41   : > { %s2752_s19 = scalar_select %p55_p6, %s2551_s23, %s3202_s15  }
  0x42   : > { %s310_s29 = scalar_lea.vmem [#allocation5], %s2737_s16  ;;  %s2568_s18 = smov [#allocation10]  }
  0x43   : > { %3203 = sst [smem:[#allocation24_spill]] %s2752_s19  ;;  %s319_s10 = sshll.u32 %s310_s29, 4  ;;  %s2761_s10 = int_to_ptr.vmem [resolvable:$true] %s319_s10 }
  0x44   : > { %s2763_s3 = sshll.u32 %s2568_s18, 4  ;;  %s2765_s13 = scalar_lea.sflag [#allocation6], %s306_s11  ;;  %s267_s3 = int_to_ptr.vmem [resolvable:$true] %s2763_s3 }
  0x45   : > { %s2758_s28 = scalar_lea.hbm %s3204_s1, %s2740_s14  ;;  %p2771_p10 = pneg %p2744_p8 }
  0x46   : > { %s2323_s15 = scalar_lea.hbm %s2758_s28, 128  ;;  %s2328_s25 = scalar_lea.hbm %s3204_s1, 256 }
  0x47   : > { %p2324_p4 = scmp.ne.s32.totalorder %s2758_s28, %s2323_s15  ;;  %p2329_p2 = scmp.lt.u32.totalorder %s2758_s28, %s3204_s1 }
  0x48   : > { %s3205_s17 = scalar_select %p2771_p10, 1, 0 }
  0x49   : > { %p2326_p12 = pnand %p2771_p10, %p2324_p4  ;;  %p2330_p11 = scmp.lt.u32.totalorder %s2328_s25, %s2323_s15 }
  0x4a   : > { %p2332_p5 = scmp.lt.u32.totalorder %s2323_s15, %s2758_s28 }
  0x4b   : > { %p2327_p0 = pneg %p2326_p12  ;;  %p2331_p13 = por %p2330_p11, %p2329_p2 }
  0x4d   : > { %p2333_p9 = por %p2332_p5, %p2331_p13 }
  0x4f   : > { %p2334_p3 = pnand %p2333_p9, %p2327_p0 }
  0x51   : > { %2337 = shalt.err (!%p2334_p3)
}
  0x52   : > { %s2338_s11 = scalar_lea.vmem %s2761_s10, 128  ;;  %s2569_s20 = smov [#allocation5]  }
  0x53   : > { %p2339_p6 = scmp.ne.s32.totalorder %s2761_s10, %s2338_s11  ;;  %s2343_s29 = sshll.u32 %s2569_s20, 4  ;;  %s2344_s29 = int_to_ptr.vmem [resolvable:$false] %s2343_s29 }
  0x54   : > { %s2345_s19 = scalar_lea.vmem %s2344_s29, 256  ;;  %p2346_p7 = scmp.lt.s32.totalorder %s2761_s10, %s2344_s29 }
  0x55   : > { %p2341_p4 = pnand %p2339_p6, %p2771_p10  ;;  %p2347_p1 = scmp.lt.s32.totalorder %s2345_s19, %s2338_s11 }
  0x57   : > { %p2342_p12 = pneg %p2341_p4  ;;  %p2348_p2 = por %p2347_p1, %p2346_p7 }
  0x59   : > { %p2349_p11 = pnand %p2348_p2, %p2342_p12 }
  0x5b   : > { %2352 = shalt.err (!%p2349_p11)
}
  0x5c   : > { %s3206_s25 = smov 4   ;;  %s3207_s15 = smov 64  }
  0x5d   : > { %2152 = dma.hbm_to_vmem [thread:$0]  (!%p2744_p8), %s2758_s28, 128, %s2761_s10, %s2765_s13, %s3207_s15, %s3207_s15, %s3206_s25  }
  0x5e   : > { %s3208_s4 = sld [smem:[#allocation27_spill]]  ;;  %p3209_p7 = scmp.ne.s32.totalorder %s3197_s12, 0 }
  0x60   : > { %p3210_p0 = pneg %p3209_p7 }
  0x64   : > { %s2353_s29 = scalar_lea.hbm %s3208_s4, 1024 }
  0x65   : > { %p2354_p1 = scmp.ne.s32.totalorder %s3208_s4, %s2353_s29  ;;  %p2360_p9 = scmp.lt.u32.totalorder %s2353_s29, %s3208_s4 }
  0x67   : > { %p2356_p13 = pnand %p2354_p1, %p3210_p0 }
  0x69   : > { %p2357_p5 = pneg %p2356_p13 }
  0x6b   : > { %p2362_p3 = pnand %p2360_p9, %p2357_p5 }
  0x6d   : > { %2365 = shalt.err (!%p2362_p3)
}
  0x6e   : > { %s2366_s28 = scalar_lea.vmem %s267_s3, 1024  ;;  %p3211_p4 = pmov %p3210_p0 }
  0x6f   : > { %p2367_p6 = scmp.ne.s32.totalorder %s267_s3, %s2366_s28  ;;  %p2374_p11 = scmp.lt.s32.totalorder %s267_s3, %s267_s3 }
  0x70   : > { %p2375_p8 = scmp.lt.s32.totalorder %s2366_s28, %s2366_s28 }
  0x71   : > { %p2369_p12 = pnand %p2367_p6, %p3211_p4 }
  0x72   : > { %p2376_p10 = por %p2375_p8, %p2374_p11 }
  0x73   : > { %p2370_p2 = pneg %p2369_p12 }
  0x75   : > { %p2377_p0 = pnand %p2376_p10, %p2370_p2 }
  0x77   : > { %2380 = shalt.err (!%p2377_p0)
}
  0x78   : > { %2145 = dma.hbm_to_vmem [thread:$0]  (!%p3209_p7), %s3208_s4, 1024, %s267_s3, [#allocation9], %s3207_s15, %s3207_s15, %s3206_s25  }
  0x79   : > { %s2826_s20 = scalar_lea.hbm %s3156_s0, %s2740_s14  ;;  %s284_s12 = scalar_lea.vmem [#allocation2], %s2737_s16 }
  0x7a   : > { %s296_s29 = sshll.u32 %s284_s12, 4  ;;  %s2835_s28 = scalar_lea.hbm %s3158_s2, %s2740_s14  ;;  %s2829_s29 = int_to_ptr.vmem [resolvable:$true] %s296_s29 }
  0x7b   : > { %s3212_s1 = sand.u32 1, %s2551_s23   ;;  %s2381_s26 = scalar_lea.hbm %s2826_s20, 128 }
  0x7c   : > { %s2839_s3 = scalar_lea.sflag [#allocation3], %s3212_s1  ;;  %p2382_p8 = scmp.ne.s32.totalorder %s2826_s20, %s2381_s26 }
  0x7d   : > { %p3213_p10 = scmp.ne.s32.totalorder %s3205_s17, 0  ;;  %s2386_s4 = scalar_lea.hbm %s3156_s0, 256 }
  0x7e   : > { %p2387_p13 = scmp.lt.u32.totalorder %s2826_s20, %s3156_s0  ;;  %p2388_p5 = scmp.lt.u32.totalorder %s2386_s4, %s2381_s26 }
  0x7f   : > { %p2384_p1 = pnand %p2382_p8, %p3213_p10  ;;  %p2390_p3 = scmp.lt.u32.totalorder %s2381_s26, %s2826_s20 }
  0x80   : > { %p2389_p9 = por %p2388_p5, %p2387_p13 }
  0x81   : > { %p2385_p7 = pneg %p2384_p1 }
  0x82   : > { %p2391_p6 = por %p2390_p3, %p2389_p9 }
  0x84   : > { %p2392_p4 = pnand %p2391_p6, %p2385_p7 }
  0x86   : > { %2395 = shalt.err (!%p2392_p4)
}
  0x87   : > { %s2396_s14 = scalar_lea.vmem %s2829_s29, 128  ;;  %s2570_s11 = smov [#allocation2]  }
  0x88   : > { %p2397_p12 = scmp.ne.s32.totalorder %s2829_s29, %s2396_s14  ;;  %s2401_s19 = sshll.u32 %s2570_s11, 4  ;;  %s2402_s19 = int_to_ptr.vmem [resolvable:$false] %s2401_s19 }
  0x89   : > { %s2403_s21 = scalar_lea.vmem %s2402_s19, 256  ;;  %p2404_p0 = scmp.lt.s32.totalorder %s2829_s29, %s2402_s19 }
  0x8a   : > { %p2399_p2 = pnand %p2397_p12, %p3213_p10  ;;  %p2405_p8 = scmp.lt.s32.totalorder %s2403_s21, %s2396_s14 }
  0x8c   : > { %p2400_p11 = pneg %p2399_p2  ;;  %p2406_p1 = por %p2405_p8, %p2404_p0 }
  0x8e   : > { %p2407_p13 = pnand %p2406_p1, %p2400_p11 }
  0x90   : > { %2410 = shalt.err (!%p2407_p13)
}
  0x91   : > { %p3214_p7 = scmp.ne.s32.totalorder %s3201_s8, 0  ;;  %s333_s4 = scalar_lea.vmem [#allocation7], %s2737_s16 }
  0x92   : > { %s345_s1 = sshll.u32 %s333_s4, 4  ;;  %s2411_s26 = scalar_lea.hbm %s2835_s28, 128  ;;  %s2867_s1 = int_to_ptr.vmem [resolvable:$true] %s345_s1 }
  0x93   : > { %2149 = dma.hbm_to_vmem [thread:$0]  (!%p3214_p7), %s2826_s20, 128, %s2829_s29, %s2839_s3, %s3207_s15, %s3207_s15, %s3206_s25  }
  0x94   : > { %p2412_p5 = scmp.ne.s32.totalorder %s2835_s28, %s2411_s26  ;;  %s2416_s12 = scalar_lea.hbm %s3158_s2, 256 }
  0x95   : > { %p2417_p6 = scmp.lt.u32.totalorder %s2835_s28, %s3158_s2  ;;  %p2418_p4 = scmp.lt.u32.totalorder %s2416_s12, %s2411_s26 }
  0x96   : > { %p2414_p9 = pnand %p2412_p5, %p3213_p10  ;;  %p2420_p2 = scmp.lt.u32.totalorder %s2411_s26, %s2835_s28 }
  0x97   : > { %p2419_p12 = por %p2418_p4, %p2417_p6 }
  0x98   : > { %p2415_p3 = pneg %p2414_p9 }
  0x99   : > { %p2421_p11 = por %p2420_p2, %p2419_p12 }
  0x9b   : > { %p2422_p0 = pnand %p2421_p11, %p2415_p3 }
  0x9d   : > { %2425 = shalt.err (!%p2422_p0)
}
  0x9e   : > { %s2426_s16 = scalar_lea.vmem %s2867_s1, 128  ;;  %s2571_s20 = smov [#allocation7]  }
  0x9f   : > { %p2427_p8 = scmp.ne.s32.totalorder %s2867_s1, %s2426_s16  ;;  %s2431_s29 = sshll.u32 %s2571_s20, 4  ;;  %s2432_s29 = int_to_ptr.vmem [resolvable:$false] %s2431_s29 }
  0xa0   : > { %s2433_s3 = scalar_lea.vmem %s2432_s29, 256  ;;  %p2434_p5 = scmp.lt.s32.totalorder %s2867_s1, %s2432_s29 }
  0xa1   : > { %p2429_p1 = pnand %p2427_p8, %p3213_p10  ;;  %p2435_p9 = scmp.lt.s32.totalorder %s2433_s3, %s2426_s16 }
  0xa3   : > { %p2430_p13 = pneg %p2429_p1  ;;  %p2436_p6 = por %p2435_p9, %p2434_p5 }
  0xa5   : > { %p2437_p4 = pnand %p2436_p6, %p2430_p13 }
  0xa7   : > { %2440 = shalt.err (!%p2437_p4)
}
  0xa8   : > { %2155 = dma.hbm_to_vmem [thread:$0]  (!%p3214_p7), %s2835_s28, 128, %s2867_s1, %s2765_s13, %s3207_s15, %s3207_s15, %s3206_s25  }
  0xa9   : > { %p3215_p10 = scmp.ne.s32.totalorder %s3196_s9, 0 }
  0xaa   : > { %s2897_s17 = sand.u32 (!%p3215_p10), 1, %s2547_s22   ;;  %p3216_p3 = scmp.ne.s32.totalorder (!%p3215_p10), %s3192_s30, 0 }
  0xab   : > { %357 = sbr.rel (%p3215_p10) target bundleno = 578 (0x242), region = 40  ;;  %s2900_s19 = sshll.u32 (!%p3215_p10), %s2897_s17, 3 }
  0xac   : > { %s360_s8 = scalar_lea.sflag (!%p3215_p10), [#allocation3], %s2897_s17  ;;  %s363_s21 = scalar_lea.vmem (!%p3215_p10), [#allocation2], %s2900_s19 }
  0xb2   : > { %2522 = dma.done.wait (%p3216_p3), %s360_s8, 128  }
  0xb3   : > { %2524 = vsyncadd (%p3216_p3), %s360_s8, 4294967168  ;;  %s368_s9 = sand.u32 1, %s2646_s27   ;;  %s372_s25 = scalar_lea.vmem [#allocation5], %s2900_s19 }
  0xb4   : > { %s369_s13 = scalar_lea.sflag [#allocation6], %s368_s9 }
  0xb5   : > { %2526 = dma.done.wait (%p3216_p3), %s369_s13, 256  }
  0xb6   : > { %2528 = vsyncadd (%p3216_p3), %s369_s13, 4294967040  ;;  %s381_s15 = scalar_lea.vmem [#allocation7], %s2900_s19  ;;  %p3217_p7 = scmp.eq.s32.totalorder %s2646_s27, 0 }
  0xb8   : > { %2530 = dma.done.wait (%p3217_p7), [#allocation9], 8192   ;;  %p3218_p12 = pmov %p3217_p7 }
  0xb9   : > { %v2572_v0 = vmov 0.0   ;;  %vm2573_vm0 = vmmov 0   ;;  %v2227_v1 = vld [vmem:[#allocation8 + $0x40] sm:$0xff]   ;;  %v2229_v3 = vld [vmem:[#allocation8 + $0x48] sm:$0xff]   ;;  %v2231_v5 = vld [vmem:[#allocation8 + $0x50] sm:$0xff]   ;;  %vm2574_vm2 = vmmov 1  }
  0xba   : > { %2532 = vsyncadd (%p3218_p12), [#allocation9], 4294959104  ;;  %1939 = vmatprep.subr.bf16.mxu1 %v2572_v0  ;;  %1999 = vmatprep.subr.bf16.mxu0 %v2572_v0  ;;  %v2228_v2 = vld [vmem:[#allocation8 + $0xc0] sm:$0xff]   ;;  %v2230_v4 = vld [vmem:[#allocation8 + $0xc8] sm:$0xff]   ;;  %v2575_v9 = vmov 0   ;;  %vm578_vm6 = vcmask 1040384  }
  0xbb   : > { %1955 = vmatprep.mubr.msk.bf16.mxu1 %vm2573_vm0, %v2572_v0  ;;  %2015 = vmatprep.mubr.msk.bf16.mxu0 %vm2573_vm0, %v2572_v0  ;;  %v2232_v6 = vld [vmem:[#allocation8 + $0xd0] sm:$0xff]   ;;  %vm516_vm1 = vmpackc.low %vm2573_vm0, %vm2573_vm0  ;;  %v2233_v7 = vld [vmem:[#allocation8 + $0x58] sm:$0xff]   ;;  %vm672_vm7 = vsmask.f32 1280  ;;  %vm1019_vm8 = vsmask.f32 7424 }
  0xbc   : > { %1940 = vmatpush3.bf16.msra.mxu1 %v2227_v1  ;;  %2000 = vmatpush3.bf16.msra.mxu0 %v2228_v2  ;;  %vm518_vm3 = vmpackc.low %vm2574_vm2, %vm2574_vm2  ;;  %v2234_v8 = vld [vmem:[#allocation8 + $0xd8] sm:$0xff]   ;;  %v522_v10 = vsel %vm516_vm1, 65537, %v2575_v9  ;;  %v2235_v12 = vld [vmem:[#allocation8 + $0x60] sm:$0xff]   ;;  %vm797_vm9 = vsmask.f32 256  ;;  %vm1137_vm10 = vcmask 1046528  }
  0xbd   : > { %1941 = vmatprep.subr.bf16.mxu1 %v2572_v0  ;;  %2001 = vmatprep.subr.bf16.mxu0 %v2572_v0  ;;  %v524_v11 = vsel %vm518_vm3, 65537, %v2575_v9  ;;  %v2236_v13 = vld [vmem:[#allocation8 + $0xe0] sm:$0xff]   ;;  %v1778_v14 = vcombine.low %v522_v10, %v522_v10  ;;  %v2237_v16 = vld [vmem:[#allocation8 + $0x68] sm:$0xff]   ;;  %v2243_v18 = vld [vmem:[%s363_s21] sm:$0xff]   ;;  %vm1250_vm11 = vsmask.f32 6400 }
  0xbe   : > { %v1779_v15 = vcombine.low %v524_v11, %v524_v11  ;;  %v2238_v17 = vld [vmem:[#allocation8 + $0xe8] sm:$0xff]   ;;  %v2239_v22 = vld [vmem:[#allocation8 + $0x70] sm:$0xff]   ;;  %v2241_v26 = vld [vmem:[#allocation8 + $0x78] sm:$0xff]   ;;  %s1861_s27 = sshll.u32 %s2555_s24, 7  ;;  %s425_s30 = scalar_lea.vmem [#allocation11], %s2900_s19 }
  0xbf   : > { %v2244_v19 = vld [vmem:[%s372_s25] sm:$0xff]   ;;  %vm2941_vm4 = vcmp.ne.s16.totalorder %v1778_v14, 0  ;;  %v2240_v23 = vld [vmem:[#allocation8 + $0xf0] sm:$0xff]   ;;  %v2242_v29 = vld [vmem:[#allocation8 + $0xf8] sm:$0xff]   ;;  %s1550_s28 = sshll.u32 %s425_s30, 4  ;;  %s3072_s26 = scalar_lea.hbm %s3161_s5, %s1861_s27  ;;  %s3074_s28 = int_to_ptr.vmem [resolvable:$true] %s1550_s28 }
  0xc0   : > { %1942 = vmatpush3.bf16.msra.mxu1 %v2229_v3  ;;  %2002 = vmatpush3.bf16.msra.mxu0 %v2230_v4  ;;  %vm2945_vm5 = vcmp.ne.s16.totalorder %v1779_v15, 0  ;;  %v2952_v24 = vsel %vm2941_vm4, %v2243_v18, 0  ;;  %v2246_v31 = vld [vmem:[#allocation8] sm:$0xff]   ;;  %v2248_v35 = vld [vmem:[#allocation8 + $0x8] sm:$0xff]   ;;  %v2250_v39 = vld [vmem:[#allocation8 + $0x10] sm:$0xff]   ;;  %s1530_s10 = scalar_lea.sflag [#allocation4], %s2897_s17 }
  0xc1   : > { %1943 = vmatprep.subr.bf16.mxu1 %v2572_v0  ;;  %2003 = vmatprep.subr.bf16.mxu0 %v2572_v0  ;;  %v2956_v25 = vsel %vm2945_vm5, %v2244_v19, 0  ;;  %v579_v27 = vrot.slane %v2952_v24, 7  ;;  %v2247_v32 = vld [vmem:[#allocation8 + $0x100] sm:$0xff]   ;;  %v2249_v36 = vld [vmem:[#allocation8 + $0x108] sm:$0xff]   ;;  %v2251_v41 = vld [vmem:[#allocation8 + $0x110] sm:$0xff]   ;;  %v674_v47 = vshrl.u32 %v2952_v24, 16 }
  0xc2   : > { %v580_v28 = vrot.slane %v2956_v25, 7  ;;  %v2967_v33 = vshrl.u32 %v2956_v25, 16  ;;  %v2970_v34 = vshll.u32 %v2956_v25, 16  ;;  %v2252_v42 = vld [vmem:[#allocation8 + $0x18] sm:$0xff]   ;;  %v2254_v45 = vld [vmem:[#allocation8 + $0x20] sm:$0xff]   ;;  %v677_v48 = vshll.u32 %v2952_v24, 16 }
  0xc3   : > { %v2253_v43 = vld [vmem:[#allocation8 + $0x118] sm:$0xff]   ;;  %v2255_v46 = vld [vmem:[#allocation8 + $0x120] sm:$0xff]   ;;  %v2256_v49 = vld [vmem:[#allocation8 + $0x28] sm:$0xff]   ;;  %v676_v52 = vrot.slane %v674_v47, 6  ;;  %v798_v21 = vrot.slane %v674_v47, 7  ;;  %s2441_s18 = scalar_lea.vmem %s3074_s28, 128 }
  0xc4   : > { %1944 = vmatpush3.bf16.msra.mxu1 %v2231_v5  ;;  %2004 = vmatpush3.bf16.msra.mxu0 %v2232_v6  ;;  %v581_v30 = vsel %vm578_vm6, %v579_v27, %v580_v28  ;;  %v1251_v37 = vrot.slane %v2967_v33, 1  ;;  %v1252_v38 = vrot.slane %v2970_v34, 2  ;;  %v2245_v44 = vld [vmem:[%s381_s15] sm:$0xff]   ;;  %v2257_v51 = vld [vmem:[#allocation8 + $0x128] sm:$0xff]   ;;  %v684_v53 = vrot.slane %v2967_v33, 6  ;;  %v2262_v4 = vld [vmem:[#allocation8 + $0x80] sm:$0xff]   ;;  %p2442_p2 = scmp.ne.s32.totalorder %s3074_s28, %s2441_s18 }
  0xc5   : > { %1945 = vmatprep.subr.bf16.mxu1 %v2572_v0  ;;  %2005 = vmatprep.subr.bf16.mxu0 %v2572_v0  ;;  %v2996_v50 = vsel %vm2941_vm4, %v2245_v44, 0  ;;  %v679_v54 = vrot.slane %v677_v48, 7  ;;  %v687_v55 = vrot.slane %v2970_v34, 7  ;;  %v2258_v56 = vld [vmem:[#allocation8 + $0x30] sm:$0xff]   ;;  %v1020_v57 = vrot.slane %v2970_v34, 1  ;;  %v2260_v60 = vld [vmem:[#allocation8 + $0x38] sm:$0xff]  }
  0xc6   : > { %v2982_v40 = vor.u32 %v1252_v38, %v1251_v37  ;;  %v2259_v58 = vld [vmem:[#allocation8 + $0x130] sm:$0xff]   ;;  %v1023_v59 = vshll.u32 %v2996_v50, 16  ;;  %v2261_v63 = vld [vmem:[#allocation8 + $0x138] sm:$0xff]   ;;  %v2263_v6 = vld [vmem:[#allocation8 + $0x140] sm:$0xff]   ;;  %v799_v18 = vrot.slane %v2967_v33, 7  ;;  %v1139_v27 = vrot.slane %v2996_v50, 1 }
  0xc7   : > { %v680_v61 = vor.u32 %v679_v54, %v676_v52  ;;  %v688_v62 = vor.u32 %v687_v55, %v684_v53  ;;  %v1021_v1 = vor.u32 %v1020_v57, %v2967_v33  ;;  %v2266_v9 = vld [vmem:[#allocation8 + $0x90] sm:$0xff]   ;;  %v2268_v11 = vld [vmem:[#allocation8 + $0x98] sm:$0xff]   ;;  %v2271_v14 = vld [vmem:[#allocation8 + $0x160] sm:$0xff]   ;;  %p3223_p11 = scmp.ne.s32.totalorder %s3193_s7, 0  ;;  %s2576_s12 = smov [#allocation11]  }
  0xc8   : > { %1946 = vmatpush3.bf16.msra.mxu1 %v2233_v7  ;;  %2006 = vmatpush3.bf16.msra.mxu0 %v2234_v8  ;;  %v1025_v2 = vrot.slane %v1023_v59, 1  ;;  %v2264_v7 = vld [vmem:[#allocation8 + $0x88] sm:$0xff]   ;;  %v2267_v10 = vld [vmem:[#allocation8 + $0x150] sm:$0xff]   ;;  %v2276_v20 = vld [vmem:[#allocation8 + $0xb8] sm:$0xff]   ;;  %s2445_s14 = sshll.u32 %s2576_s12, 4  ;;  %s2446_s14 = int_to_ptr.vmem [resolvable:$false] %s2445_s14 }
  0xc9   : > { %1947 = vmatprep.subr.bf16.mxu1 %v2572_v0  ;;  %2007 = vmatprep.subr.bf16.mxu0 %v2572_v0  ;;  %v689_v3 = vsel %vm672_vm7, %v680_v61, %v688_v62  ;;  %v2265_v8 = vld [vmem:[#allocation8 + $0x148] sm:$0xff]   ;;  %v2282_v33 = vld [vmem:[#allocation8 + $0x190] sm:$0xff]   ;;  %v2286_v37 = vld [vmem:[#allocation8 + $0x1a0] sm:$0xff]   ;;  %p2443_p0 = pnand %p2442_p2, %p3223_p11  ;;  %s2447_s11 = scalar_lea.vmem %s2446_s14, 256 }
  0xca   : > { %v1026_v5 = vsel %vm1019_vm8, %v1021_v1, %v1025_v2  ;;  %v2272_v15 = vld [vmem:[#allocation8 + $0xa8] sm:$0xff]   ;;  %v2292_v47 = vld [vmem:[#allocation8 + $0x1b8] sm:$0xff]   ;;  %p2448_p1 = scmp.lt.s32.totalorder %s3074_s28, %s2446_s14  ;;  %p2449_p13 = scmp.lt.s32.totalorder %s2447_s11, %s2441_s18 }
  0xcb   : > { %v2289_v38 = vld [vmem:[#allocation10 + $0x28] sm:$0xff]   ;;  %p2444_p8 = pneg %p2443_p0 }
  0xcc   : > { %1948 = vmatpush3.bf16.msra.mxu1 %v2235_v12  ;;  %2008 = vmatpush3.bf16.msra.mxu0 %v2236_v13  ;;  %v2269_v12 = vld [vmem:[#allocation8 + $0x158] sm:$0xff]   ;;  %v2270_v13 = vld [vmem:[#allocation8 + $0xa0] sm:$0xff]   ;;  %p2450_p5 = por %p2449_p13, %p2448_p1 }
  0xcd   : > { %1949 = vmatprep.subr.bf16.mxu1 %v2572_v0  ;;  %2009 = vmatprep.subr.bf16.mxu0 %v2572_v0 }
  0xce   : > { %p2451_p9 = pnand %p2450_p5, %p2444_p8 }
  0xd0   : > { %1950 = vmatpush3.bf16.msra.mxu1 %v2237_v16  ;;  %2010 = vmatpush3.bf16.msra.mxu0 %v2238_v17  ;;  %v2273_v16 = vld [vmem:[#allocation8 + $0x168] sm:$0xff]   ;;  %v2274_v17 = vld [vmem:[#allocation8 + $0xb0] sm:$0xff]  }
  0xd1   : > { %1951 = vmatprep.subr.bf16.mxu1 %v2572_v0  ;;  %2011 = vmatprep.subr.bf16.mxu0 %v2572_v0 }
  0xd4   : > { %1952 = vmatpush3.bf16.msra.mxu1 %v2239_v22  ;;  %2012 = vmatpush3.bf16.msra.mxu0 %v2240_v23  ;;  %v800_v22 = vor.u32 %v799_v18, %v2970_v34  ;;  %v2277_v23 = vld [vmem:[#allocation8 + $0x178] sm:$0xff]  }
  0xd5   : > { %1953 = vmatprep.subr.bf16.mxu1 %v2572_v0  ;;  %2013 = vmatprep.subr.bf16.mxu0 %v2572_v0  ;;  %v2285_v34 = vld [vmem:[#allocation10 + $0x18] sm:$0xff]  }
  0xd6   : > { %v801_v28 = vsel %vm797_vm9, %v798_v21, %v800_v22 }
  0xd8   : > { %1954 = vmatpush3.bf16.msra.mxu1 %v2241_v26  ;;  %2014 = vmatpush3.bf16.msra.mxu0 %v2242_v29  ;;  %v1138_v26 = vrot.slane %v2956_v25, 1  ;;  %v2279_v29 = vld [vmem:[#allocation10] sm:$0xff]   ;;  %v2280_v25 = vld [vmem:[#allocation8 + $0x188] sm:$0xff]  }
  0xd9   : > { %1959 = vmatprep.subr.bf16.mxu1 %v2572_v0  ;;  %2019 = vmatprep.subr.bf16.mxu0 %v2572_v0 }
  0xda   : > { %v1140_v24 = vsel %vm1137_vm10, %v1138_v26, %v1139_v27 }
  0xdb   : > { %1956 = vmatmul.mubr.bf16.vlgmr.msra.gmra.mrb[0].mxu1 %v581_v30  ;;  %2016 = vmatmul.mubr.msk.bf16.vlgmr.msra.gmra.mrb[0].mxu0 %vm2945_vm5, %v2244_v19  ;;  %v2275_v19 = vld [vmem:[#allocation8 + $0x170] sm:$0xff]   ;;  %v2278_v30 = vld [vmem:[#allocation8 + $0x180] sm:$0xff]  }
  0xdc   : > { %1960 = vmatpush3.bf16.msra.mxu1 %v2246_v31  ;;  %2020 = vmatpush3.bf16.msra.mxu0 %v2247_v32  ;;  %v2281_v31 = vld [vmem:[#allocation10 + $0x8] sm:$0xff]   ;;  %v2283_v32 = vld [vmem:[#allocation10 + $0x10] sm:$0xff]  }
  0xdd   : > { %1961 = vmatprep.subr.bf16.mxu1 %v2572_v0  ;;  %2021 = vmatprep.subr.bf16.mxu0 %v2572_v0 }
  0xde   : > { %1975 = vmatprep.mubr.msk.bf16.mxu1 %vm2573_vm0, %v2572_v0  ;;  %2035 = vmatprep.mubr.msk.bf16.mxu0 %vm2573_vm0, %v2572_v0 }
  0xe0   : > { %1962 = vmatpush3.bf16.msra.mxu1 %v2248_v35  ;;  %2022 = vmatpush3.bf16.msra.mxu0 %v2249_v36  ;;  %v2284_v35 = vld [vmem:[#allocation8 + $0x198] sm:$0xff]   ;;  %v2287_v36 = vld [vmem:[#allocation10 + $0x20] sm:$0xff]  }
  0xe1   : > { %1963 = vmatprep.subr.bf16.mxu1 %v2572_v0  ;;  %2023 = vmatprep.subr.bf16.mxu0 %v2572_v0 }
  0xe4   : > { %1964 = vmatpush3.bf16.msra.mxu1 %v2250_v39  ;;  %2024 = vmatpush3.bf16.msra.mxu0 %v2251_v41  ;;  %v2288_v39 = vld [vmem:[#allocation8 + $0x1a8] sm:$0xff]   ;;  %v1254_v41 = vshrl.u32 %v2996_v50, 16 }
  0xe5   : > { %1965 = vmatprep.subr.bf16.mxu1 %v2572_v0  ;;  %2025 = vmatprep.subr.bf16.mxu0 %v2572_v0 }
  0xe6   : > { %v1256_v44 = vrot.slane %v1254_v41, 1 }
  0xe8   : > { %1966 = vmatpush3.bf16.msra.mxu1 %v2252_v42  ;;  %2026 = vmatpush3.bf16.msra.mxu0 %v2253_v43  ;;  %v2291_v42 = vld [vmem:[#allocation10 + $0x30] sm:$0xff]  }
  0xe9   : > { %1967 = vmatprep.subr.bf16.mxu1 %v2572_v0  ;;  %2027 = vmatprep.subr.bf16.mxu0 %v2572_v0  ;;  %v2290_v43 = vld [vmem:[#allocation8 + $0x1b0] sm:$0xff]  }
  0xec   : > { %1968 = vmatpush3.bf16.msra.mxu1 %v2254_v45  ;;  %2028 = vmatpush3.bf16.msra.mxu0 %v2255_v46  ;;  %v1257_v45 = vrot.slane %v1023_v59, 2  ;;  %v2293_v46 = vld [vmem:[#allocation10 + $0x38] sm:$0xff]  }
  0xed   : > { %1969 = vmatprep.subr.bf16.mxu1 %v2572_v0  ;;  %2029 = vmatprep.subr.bf16.mxu0 %v2572_v0 }
  0xee   : > { %v1258_v48 = vor.u32 %v1257_v45, %v1256_v44 }
  0xf0   : > { %1970 = vmatpush3.bf16.msra.mxu1 %v2256_v49  ;;  %2030 = vmatpush3.bf16.msra.mxu0 %v2257_v51  ;;  %v2294_v49 = vld [vmem:[%s372_s25] sm:$0xff]   ;;  %v1259_v50 = vsel %vm1250_vm11, %v2982_v40, %v1258_v48 }
  0xf1   : > { %1971 = vmatprep.subr.bf16.mxu1 %v2572_v0  ;;  %2031 = vmatprep.subr.bf16.mxu0 %v2572_v0 }
  0xf4   : > { %1972 = vmatpush3.bf16.msra.mxu1 %v2258_v56  ;;  %2032 = vmatpush3.bf16.msra.mxu0 %v2259_v58 }
  0xf5   : > { %1973 = vmatprep.subr.bf16.mxu1 %v2572_v0  ;;  %2033 = vmatprep.subr.bf16.mxu0 %v2572_v0 }
  0xf8   : > { %1974 = vmatpush3.bf16.msra.mxu1 %v2260_v60  ;;  %2034 = vmatpush3.bf16.msra.mxu0 %v2261_v63 }
  0xf9   : > { %1979 = vmatprep.subr.bf16.mxu1 %v2572_v0  ;;  %2039 = vmatprep.subr.bf16.mxu0 %v2572_v0 }
  0xfb   : > { %1976 = vmatmul.mubr.bf16.vlgmr.msra.gmra.mrb[0].mxu1 %v689_v3  ;;  %2036 = vmatmul.mubr.bf16.vlgmr.msra.gmra.mrb[0].mxu0 %v1026_v5 }
  0xfc   : > { %1980 = vmatpush3.bf16.msra.mxu1 %v2262_v4  ;;  %2040 = vmatpush3.bf16.msra.mxu0 %v2263_v6 }
  0xfd   : > { %1981 = vmatprep.subr.bf16.mxu1 %v2572_v0  ;;  %2041 = vmatprep.subr.bf16.mxu0 %v2572_v0 }
  0xfe   : > { %1995 = vmatprep.mubr.msk.bf16.mxu1 %vm2573_vm0, %v2572_v0  ;;  %2055 = vmatprep.mubr.msk.bf16.mxu0 %vm2573_vm0, %v2572_v0 }
 0x100   : > { %1982 = vmatpush3.bf16.msra.mxu1 %v2264_v7  ;;  %2042 = vmatpush3.bf16.msra.mxu0 %v2265_v8 }
 0x101   : > { %1983 = vmatprep.subr.bf16.mxu1 %v2572_v0  ;;  %2043 = vmatprep.subr.bf16.mxu0 %v2572_v0 }
 0x104   : > { %1984 = vmatpush3.bf16.msra.mxu1 %v2266_v9  ;;  %2044 = vmatpush3.bf16.msra.mxu0 %v2267_v10 }
 0x105   : > { %1985 = vmatprep.subr.bf16.mxu1 %v2572_v0  ;;  %2045 = vmatprep.subr.bf16.mxu0 %v2572_v0 }
 0x108   : > { %1986 = vmatpush3.bf16.msra.mxu1 %v2268_v11  ;;  %2046 = vmatpush3.bf16.msra.mxu0 %v2269_v12 }
 0x109   : > { %1987 = vmatprep.subr.bf16.mxu1 %v2572_v0  ;;  %2047 = vmatprep.subr.bf16.mxu0 %v2572_v0 }
 0x10c   : > { %1988 = vmatpush3.bf16.msra.mxu1 %v2270_v13  ;;  %2048 = vmatpush3.bf16.msra.mxu0 %v2271_v14 }
 0x10d   : > { %1989 = vmatprep.subr.bf16.mxu1 %v2572_v0  ;;  %2049 = vmatprep.subr.bf16.mxu0 %v2572_v0 }
 0x110   : > { %1990 = vmatpush3.bf16.msra.mxu1 %v2272_v15  ;;  %2050 = vmatpush3.bf16.msra.mxu0 %v2273_v16 }
 0x111   : > { %1991 = vmatprep.subr.bf16.mxu1 %v2572_v0  ;;  %2051 = vmatprep.subr.bf16.mxu0 %v2572_v0 }
 0x114   : > { %1992 = vmatpush3.bf16.msra.mxu1 %v2274_v17  ;;  %2052 = vmatpush3.bf16.msra.mxu0 %v2275_v19 }
 0x115   : > { %1993 = vmatprep.subr.bf16.mxu1 %v2572_v0  ;;  %2053 = vmatprep.subr.bf16.mxu0 %v2572_v0 }
 0x118   : > { %1994 = vmatpush3.bf16.msra.mxu1 %v2276_v20  ;;  %2054 = vmatpush3.bf16.msra.mxu0 %v2277_v23 }
 0x119   : > { %2079 = vmatprep.subr.bf16.mxu1 %v2572_v0  ;;  %2059 = vmatprep.subr.bf16.mxu0 %v2572_v0 }
 0x11b   : > { %1996 = vmatmul.mubr.bf16.vlgmr.msra.gmra.mrb[0].mxu1 %v801_v28  ;;  %2056 = vmatmul.mubr.bf16.vlgmr.msra.gmra.mrb[0].mxu0 %v1140_v24 }
 0x11c   : > { %2080 = vmatpush3.bf16.msra.mxu1 %v2279_v29  ;;  %2060 = vmatpush3.bf16.msra.mxu0 %v2278_v30 }
 0x11d   : > { %2081 = vmatprep.subr.bf16.mxu1 %v2572_v0  ;;  %2061 = vmatprep.subr.bf16.mxu0 %v2572_v0 }
 0x11e   : > { %2075 = vmatprep.mubr.msk.bf16.mxu0 %vm2573_vm0, %v2572_v0  ;;  %2095 = vmatprep.mubr.msk.bf16.mxu1 %vm2573_vm0, %v2572_v0 }
 0x120   : > { %2082 = vmatpush3.bf16.msra.mxu1 %v2281_v31  ;;  %2062 = vmatpush3.bf16.msra.mxu0 %v2280_v25 }
 0x121   : > { %2083 = vmatprep.subr.bf16.mxu1 %v2572_v0  ;;  %2063 = vmatprep.subr.bf16.mxu0 %v2572_v0 }
 0x124   : > { %2084 = vmatpush3.bf16.msra.mxu1 %v2283_v32  ;;  %2064 = vmatpush3.bf16.msra.mxu0 %v2282_v33 }
 0x125   : > { %2085 = vmatprep.subr.bf16.mxu1 %v2572_v0  ;;  %2065 = vmatprep.subr.bf16.mxu0 %v2572_v0 }
 0x128   : > { %2086 = vmatpush3.bf16.msra.mxu1 %v2285_v34  ;;  %2066 = vmatpush3.bf16.msra.mxu0 %v2284_v35 }
 0x129   : > { %2087 = vmatprep.subr.bf16.mxu1 %v2572_v0  ;;  %2067 = vmatprep.subr.bf16.mxu0 %v2572_v0 }
 0x12c   : > { %2088 = vmatpush3.bf16.msra.mxu1 %v2287_v36  ;;  %2068 = vmatpush3.bf16.msra.mxu0 %v2286_v37 }
 0x12d   : > { %2089 = vmatprep.subr.bf16.mxu1 %v2572_v0  ;;  %2069 = vmatprep.subr.bf16.mxu0 %v2572_v0 }
 0x130   : > { %2090 = vmatpush3.bf16.msra.mxu1 %v2289_v38  ;;  %2070 = vmatpush3.bf16.msra.mxu0 %v2288_v39 }
 0x131   : > { %2091 = vmatprep.subr.bf16.mxu1 %v2572_v0  ;;  %2071 = vmatprep.subr.bf16.mxu0 %v2572_v0 }
 0x134   : > { %2092 = vmatpush3.bf16.msra.mxu1 %v2291_v42  ;;  %2072 = vmatpush3.bf16.msra.mxu0 %v2290_v43 }
 0x135   : > { %2093 = vmatprep.subr.bf16.mxu1 %v2572_v0  ;;  %2073 = vmatprep.subr.bf16.mxu0 %v2572_v0 }
 0x138   : > { %2094 = vmatpush3.bf16.msra.mxu1 %v2293_v46  ;;  %2074 = vmatpush3.bf16.msra.mxu0 %v2292_v47 }
 0x13b   : > { %2096 = vmatmul.mubr.bf16.vlgmr.msra.gmra.mrb[4].mxu1 %v2294_v49  ;;  %2076 = vmatmul.mubr.bf16.vlgmr.msra.gmra.mrb[0].mxu0 %v1259_v50 }
 0x1ee   : > { %v885_v51 = vpop.f32.mrb[0].mxu1 }
 0x1ef   : > { %v1997_v52 = vpop.f32.mrb[1].mxu1 }
 0x1f0   : > { %v888_v53 = vpop.f32.mrb[2].mxu1 }
 0x1f1   : > { %v1998_v54 = vpop.f32.mrb[3].mxu1 }
 0x20e   : > { %v1495_v55 = vpop.f32.mrb[4].mxu1  ;;  %v1343_v56 = vpop.f32.mrb[0].mxu0 }
 0x20f   : > { %v1511_v57 = vmul.f32 %v1495_v55, %v1495_v55  ;;  %v2097_v0 = vpop.f32.mrb[5].mxu1  ;;  %v2099_v58 = vadd.f32 %v1343_v56, %v885_v51  ;;  %v2077_v59 = vpop.f32.mrb[1].mxu0 }
 0x210   : > { %v1498_v60 = vpop.f32.mrb[6].mxu1  ;;  %v1346_v61 = vpop.f32.mrb[2].mxu0 }
 0x211   : > { %v1504_v62 = vadd.f32 %v1498_v60, %v1495_v55  ;;  %v1512_v40 = vmul.f32 %v1498_v60, %v1498_v60  ;;  %v2098_v63 = vpop.f32.mrb[7].mxu1  ;;  %v2100_v1 = vadd.f32 %v1346_v61, %v888_v53  ;;  %v2078_v2 = vpop.f32.mrb[3].mxu0  ;;  %v1380_v5 = vmul.f32 %v2099_v58, %v2099_v58 }
 0x213   : > { %v1505_v3 = vrot.slane %v1504_v62, 4  ;;  %v1513_v4 = vadd.f32 %v1512_v40, %v1511_v57  ;;  %v1865_v6 = vpack.c.bf16 %v2100_v1, %v2099_v58  ;;  %v1373_v7 = vadd.f32 %v2100_v1, %v2099_v58 }
 0x214   : > { %v1381_v8 = vmul.f32 %v2100_v1, %v2100_v1 }
 0x215   : > { %v1506_v9 = vadd.f32 %v1505_v3, %v1504_v62  ;;  %v1514_v10 = vrot.slane %v1513_v4, 4  ;;  %1866 = vst [vmem:[%s425_s30] sm:$0xff] %v1865_v6   ;;  %v1374_v11 = vrot.slane %v1373_v7, 4 }
 0x216   : > { %v1382_v12 = vadd.f32 %v1381_v8, %v1380_v5 }
 0x217   : > { %v1507_v13 = vrot.slane %v1506_v9, 2  ;;  %v1515_v14 = vadd.f32 %v1514_v10, %v1513_v4 }
 0x218   : > { %2454 = shalt.err (!%p2451_p9)
}
 0x219   : > { %s2455_s16 = scalar_lea.hbm %s3072_s26, 128  ;;  %s2459_s3 = scalar_lea.hbm %s3161_s5, 256 }
 0x21a   : > { %p2456_p6 = scmp.ne.s32.totalorder %s3072_s26, %s2455_s16  ;;  %p2460_p3 = scmp.lt.u32.totalorder %s3072_s26, %s3161_s5 }
 0x21b   : > { %p2461_p7 = scmp.lt.u32.totalorder %s2459_s3, %s2455_s16  ;;  %p2463_p2 = scmp.lt.u32.totalorder %s2455_s16, %s3072_s26 }
 0x21c   : > { %p2457_p4 = pnand %p2456_p6, %p3223_p11 }
 0x21d   : > { %p2462_p12 = por %p2461_p7, %p2460_p3 }
 0x21e   : > { %p2458_p10 = pneg %p2457_p4 }
 0x21f   : > { %p2464_p0 = por %p2463_p2, %p2462_p12 }
 0x221   : > { %p2465_p8 = pnand %p2464_p0, %p2458_p10 }
 0x223   : > { %2468 = shalt.err (!%p2465_p8)
}
 0x224   : > { %s2577_s9 = smov 64   ;;  %s2578_s13 = smov 4   ;;  %v1375_v15 = vadd.f32 %v1374_v11, %v1373_v7  ;;  %v1383_v16 = vrot.slane %v1382_v12, 4  ;;  %v1516_v17 = vrot.slane %v1515_v14, 2  ;;  %v1508_v20 = vadd.f32 %v1507_v13, %v1506_v9 }
 0x225   : > { %2135 = dma.vmem_to_hbm [thread:$0]  (%p3223_p11), %s3074_s28, 128, %s3072_s26, %s1530_s10, %s2577_s9, %s2577_s9, %s2578_s13   ;;  %vm1522_vm12 = vcmask 1041408   ;;  %vm1524_vm13 = vcmask 1042432   ;;  %vm1526_vm14 = vcmask 1043456  }
 0x226   : > { %v1376_v18 = vrot.slane %v1375_v15, 2  ;;  %v1384_v19 = vadd.f32 %v1383_v16, %v1382_v12  ;;  %v1517_v23 = vadd.f32 %v1516_v17, %v1515_v14  ;;  %v1509_v28 = vrot.slane %v1508_v20, 1  ;;  %s432_s25 = scalar_lea.vmem [#allocation12], %s2900_s19  ;;  %s3107_s4 = scalar_lea.hbm %s3162_s6, %s1861_s27 }
 0x227   : > { %s1567_s15 = sshll.u32 %s432_s25, 4  ;;  %s1535_s19 = scalar_lea.sflag [#allocation13], %s2897_s17  ;;  %s3109_s15 = int_to_ptr.vmem [resolvable:$true] %s1567_s15 }
 0x228   : > { %v1377_v21 = vadd.f32 %v1376_v18, %v1375_v15  ;;  %v1385_v22 = vrot.slane %v1384_v19, 2  ;;  %v1518_v24 = vrot.slane %v1517_v23, 1  ;;  %v1510_v25 = vadd.f32 %v1509_v28, %v1508_v20  ;;  %s2469_s1 = scalar_lea.vmem %s3109_s15, 128  ;;  %s2579_s26 = smov [#allocation12]  }
 0x229   : > { %p2470_p1 = scmp.ne.s32.totalorder %s3109_s15, %s2469_s1  ;;  %s2473_s24 = sshll.u32 %s2579_s26, 4  ;;  %s2474_s24 = int_to_ptr.vmem [resolvable:$false] %s2473_s24 }
 0x22a   : > { %v1378_v26 = vrot.slane %v1377_v21, 1  ;;  %v1386_v27 = vadd.f32 %v1385_v22, %v1384_v19  ;;  %v1519_v32 = vadd.f32 %v1518_v24, %v1517_v23  ;;  %s2475_s10 = scalar_lea.vmem %s2474_s24, 256  ;;  %p2476_p9 = scmp.lt.s32.totalorder %s3109_s15, %s2474_s24 }
 0x22b   : > { %p2471_p13 = pnand %p2470_p1, %p3223_p11  ;;  %p2477_p6 = scmp.lt.s32.totalorder %s2475_s10, %s2469_s1 }
 0x22c   : > { %v1387_v29 = vrot.slane %v1386_v27, 1  ;;  %v1379_v30 = vadd.f32 %v1378_v26, %v1377_v21 }
 0x22d   : > { %p2472_p5 = pneg %p2471_p13  ;;  %p2478_p4 = por %p2477_p6, %p2476_p9 }
 0x22e   : > { %v1388_v31 = vadd.f32 %v1387_v29, %v1386_v27 }
 0x22f   : > { %p2479_p10 = pnand %p2478_p4, %p2472_p5 }
 0x230   : > { %v1521_v33 = vsel %vm578_vm6, %v1379_v30, %v1388_v31 }
 0x231   : > { %v1523_v34 = vsel %vm1522_vm12, %v1521_v33, %v1510_v25 }
 0x232   : > { %v1525_v35 = vsel %vm1524_vm13, %v1523_v34, %v1519_v32 }
 0x233   : > { %v1527_v36 = vsel %vm1526_vm14, %v1525_v35, 0.0 }
 0x234   : > { %1528 = vst [vmem:[%s432_s25] sm:$0xff] %v1527_v36 }
 0x235   : > { %2482 = shalt.err (!%p2479_p10)
}
 0x236   : > { %s2483_s17 = scalar_lea.hbm %s3107_s4, 128  ;;  %s2487_s12 = scalar_lea.hbm %s3162_s6, 256 }
 0x237   : > { %p2484_p3 = scmp.ne.s32.totalorder %s3107_s4, %s2483_s17  ;;  %p2488_p2 = scmp.lt.u32.totalorder %s3107_s4, %s3162_s6 }
 0x238   : > { %p2489_p0 = scmp.lt.u32.totalorder %s2487_s12, %s2483_s17  ;;  %p2491_p1 = scmp.lt.u32.totalorder %s2483_s17, %s3107_s4 }
 0x239   : > { %p2485_p7 = pnand %p2484_p3, %p3223_p11 }
 0x23a   : > { %p2490_p8 = por %p2489_p0, %p2488_p2 }
 0x23b   : > { %p2486_p12 = pneg %p2485_p7 }
 0x23c   : > { %p2492_p13 = por %p2491_p1, %p2490_p8 }
 0x23e   : > { %p2493_p5 = pnand %p2492_p13, %p2486_p12 }
 0x240   : > { %2496 = shalt.err (!%p2493_p5)
}
 0x241   : > { %2136 = dma.vmem_to_hbm [thread:$0]  (%p3223_p11), %s3109_s15, 128, %s3107_s4, %s1535_s19  }
 0x242 PF: > { %s3224_s16 = sld [smem:[#allocation19_spill]]  ;;  %s3225_s20 = sld [smem:[#allocation22_spill]] }
 0x243   : > { %s3226_s29 = sld [smem:[#allocation21_spill]] }
 0x248   : > { %s1579_s3 = sand.u32 1, %s3224_s16   ;;  %p3227_p9 = scmp.ne.s32.totalorder %s3225_s20, 0 }
 0x249   : > { %p3228_p6 = scmp.ge.s32.totalorder %s3226_s29, 2  ;;  %s1580_s8 = scalar_lea.sflag [#allocation4], %s1579_s3 }
 0x24b   : > { %p2157_p4 = pnand %p3228_p6, %p3227_p9 }
 0x24d   : > { %2534 = dma.done.wait (!%p2157_p4), %s1580_s8, 128  }
 0x24e   : > { %2536 = vsyncadd (!%p2157_p4), %s1580_s8, 4294967168  ;;  %s1589_s21 = scalar_lea.sflag [#allocation13], %s1579_s3 }
 0x24f   : > { %2538 = dma.done.wait (!%p2157_p4), %s1589_s21, 128  }
 0x250   : > { %2540 = vsyncadd (!%p2157_p4), %s1589_s21, 4294967168  ;;  %s30_s26 = sadd.s32 1, %s3226_s29   ;;  %s3229_s7 = sld [smem:[#allocation24_spill]] }
 0x251   : > { %p27_p10 = scmp.ge.s32.totalorder %s30_s26, 4   ;;  %s3230_s24 = sld [smem:[#allocation20_spill]] }
 0x252   : > { %s3231_s25 = sld [smem:[#allocation23_spill]]  ;;  %s3232_s21 = smov %s2547_s22 }
 0x253   : > { %s3233_s22 = smov %s2551_s23  ;;  %29 = sbr.rel (!%p27_p10) target bundleno = 15 (0xf), region = 140 }
 0x256   : > { %s3234_s23 = smov %s3229_s7 }
 0x25a   :  { %1594 = vsyncpa [#allocation3], 1 }
 0x25b   :  { %1596 = vsyncpa [#allocation3 + $0x1], 1 }
 0x25c   :  { %1597 = vsyncpa [#allocation6], 1 }
 0x25d   :  { %1599 = vsyncpa [#allocation6 + $0x1], 1 }
 0x25e   :  { %1600 = vsyncpa [#allocation9], 1 }
 0x25f   :  { %1601 = vsyncpa [#allocation4], 1 }
 0x260   :  { %1603 = vsyncpa [#allocation4 + $0x1], 1 }
 0x261   :  { %1604 = vsyncpa [#allocation13], 1 }
 0x262   :  { %1606 = vsyncpa [#allocation13 + $0x1], 1 }

</bundles_post_ra>
